<compile_context>
chip_gen: v7x
topology: tpu7x:2x2x1
jax: 0.10.0
libtpu: 0.0.40
codegen_flags: <defaults>
</compile_context>

<pallas_src>
import functools
import math

import jax
import jax.numpy as jnp
from jax import lax
from jax.experimental import pallas as pl
from jax.experimental.pallas import tpu as pltpu

E = 64          # embed_dim
H = 4           # num_heads
DH = E // H     # head_dim = 16


def _round_up(x, m):
    return (x + m - 1) // m * m


# ---------------------------------------------------------------------------
# Per-batch fused MHA kernel body (one grid step == one batch item).
#   x1_ref : (1, Lq_pad, E)  query rows, padded to a multiple of 8
#   x2_ref : (1, Lk_pad, E)  key/value rows, padded to a multiple of 8
#   wq_ref : (E, E)    Q projection (pre-transposed, softmax scale folded in)
#   wkv_ref: (E, 2E)   fused K/V projection (pre-transposed, lane-dense output)
#   bq_ref : (1, E)    bkv_ref: (1, 2E)
#   wo_ref : (E, E)    output projection (pre-transposed)   bo_ref: (1, E)
#   o_ref  : (1, Lq, E) unpadded output rows for this batch item
# ---------------------------------------------------------------------------
def _mha_kernel(x1_ref, x2_ref, wq_ref, wkv_ref, bq_ref, bkv_ref,
                wo_ref, bo_ref, o_ref, *, lq, lk, lk_pad):
    xq = x1_ref[0]                        # (Lqp, E)
    xkv = x2_ref[0]                       # (Lkp, E)
    lq_pad = xq.shape[0]

    # --- input projections (MXU, f32 accumulation) -----------------------
    # For large N*L, cast operands to bf16 here (keep f32 accumulation) for
    # ~3x MXU throughput on v5e/v6e/v7x; kept f32 to preserve reference
    # accuracy at these tiny shapes.
    q = jnp.dot(xq, wq_ref[...], preferred_element_type=jnp.float32) + bq_ref[...]
    kv = jnp.dot(xkv, wkv_ref[...], preferred_element_type=jnp.float32) + bkv_ref[...]

    # --- head-major views (one relayout each, no per-head lane slicing) --
    qh = q.reshape(lq_pad, H, DH).transpose(1, 0, 2)          # (H,  Lqp, DH)
    kvh = kv.reshape(lk_pad, 2 * H, DH).transpose(1, 0, 2)    # (2H, Lkp, DH)
    kh = kvh[:H]                                              # (H, Lkp, DH)
    vh = kvh[H:]                                              # (H, Lkp, DH)

    # --- scores + softmax, batched over all heads at once ----------------
    s = jnp.einsum("hqd,hkd->hqk", qh, kh,
                   preferred_element_type=jnp.float32)        # (H, Lqp, Lkp)
    if lk_pad != lk:                                          # mask padded keys
        col = lax.broadcasted_iota(jnp.int32, s.shape, 2)
        s = jnp.where(col < lk, s, -1e30)
    m = jnp.max(s, axis=-1, keepdims=True)
    e = jnp.exp(s - m)
    l = jnp.sum(e, axis=-1, keepdims=True)
    inv = pl.reciprocal(l, approx=True)        # EUP vrcp (separate VLIW slot)
    inv = inv * (2.0 - l * inv)                # one Newton step -> f32 accuracy
    p = e * inv

    # --- weighted values + output projection -----------------------------
    ctx = jnp.einsum("hqk,hkd->hqd", p, vh,
                     preferred_element_type=jnp.float32)      # (H, Lqp, DH)
    attn = ctx.transpose(1, 0, 2).reshape(lq_pad, E)          # (Lqp, E)
    y = jnp.dot(attn, wo_ref[...], preferred_element_type=jnp.float32) + bo_ref[...]
    o_ref[0, :, :] = y[:lq].astype(o_ref.dtype)               # drop padded q rows


# ---------------------------------------------------------------------------
# torch.nn.MultiheadAttention(E, H) forward (batch_first=False, no masks),
# query = x1, key = value = x2; returns the attention output (Lq, N, E).
# ---------------------------------------------------------------------------
def multihead_attention(x1, x2, params):
    lq, n, _ = x1.shape
    lk = x2.shape[0]
    lq_pad = _round_up(lq, 8)
    lk_pad = _round_up(lk, 8)
    scale = 1.0 / math.sqrt(DH)

    in_w = params["in_proj_weight"]          # (3E, E)
    in_b = params["in_proj_bias"]            # (3E,)
    # Pre-transpose so every in-kernel matmul is plain A @ B; fold the softmax
    # scale into the Q projection; fuse K and V into one (E, 2E) projection.
    wq_t = (in_w[:E] * scale).T              # (E, E)
    wkv_t = in_w[E:].T                       # (E, 2E)
    bq = (in_b[:E] * scale).reshape(1, E)
    bkv = in_b[E:].reshape(1, 2 * E)
    wo_t = params["out_proj_weight"].T       # (E, E)
    bo = params["out_proj_bias"].reshape(1, E)

    # (L, N, E) -> batch-major (N, L_pad, E); transpose + pad fuse into one
    # tiny XLA op per operand (batch must lead so the grid can index it while
    # the block's last two dims stay full / 8-aligned).
    x1b = jnp.transpose(x1, (1, 0, 2))
    x2b = jnp.transpose(x2, (1, 0, 2))
    if lq_pad != lq:
        x1b = jnp.pad(x1b, ((0, 0), (0, lq_pad - lq), (0, 0)))
    if lk_pad != lk:
        x2b = jnp.pad(x2b, ((0, 0), (0, lk_pad - lk), (0, 0)))

    flops = n * (2 * lq_pad * E * E                 # Q projection
                 + 2 * lk_pad * E * 2 * E           # fused K/V projection
                 + 4 * H * lq_pad * lk_pad * DH     # scores + p@v
                 + 2 * lq_pad * E * E)              # output projection
    bytes_accessed = sum(int(a.size) * a.dtype.itemsize
                         for a in (x1b, x2b, wq_t, wkv_t, bq, bkv, wo_t, bo))
    bytes_accessed += n * lq * E * 4
    cost = pl.CostEstimate(flops=flops,
                           transcendentals=n * H * lq_pad * lk_pad,
                           bytes_accessed=bytes_accessed)

    kern = functools.partial(_mha_kernel, lq=lq, lk=lk, lk_pad=lk_pad)
    const = lambda b: (0, 0)                 # weights stay resident across grid

    out_b = pl.pallas_call(
        kern,
        out_shape=jax.ShapeDtypeStruct((n, lq, E), x1.dtype),
        grid=(n,),
        in_specs=[
            pl.BlockSpec((1, lq_pad, E), lambda b: (b, 0, 0)),   # x1 (this batch)
            pl.BlockSpec((1, lk_pad, E), lambda b: (b, 0, 0)),   # x2 (this batch)
            pl.BlockSpec((E, E), const),                         # wq_t
            pl.BlockSpec((E, 2 * E), const),                     # wkv_t
            pl.BlockSpec((1, E), const),                         # bq
            pl.BlockSpec((1, 2 * E), const),                     # bkv
            pl.BlockSpec((E, E), const),                         # wo_t
            pl.BlockSpec((1, E), const),                         # bo
        ],
        out_specs=pl.BlockSpec((1, lq, E), lambda b: (b, 0, 0)),
        compiler_params=pltpu.CompilerParams(
            dimension_semantics=("parallel",)),    # v7x megacore batch split
        cost_estimate=cost,
    )(x1b, x2b, wq_t, wkv_t, bq, bkv, wo_t, bo)

    # (N, Lq, E) -> (Lq, N, E) (seq-first, torch MHA batch_first=False)
    return jnp.transpose(out_b, (1, 0, 2))


# ---------------------------------------------------------------------------
# pure-JAX reference (highest matmul precision) for sanity checking
# ---------------------------------------------------------------------------
def multihead_attention_ref(x1, x2, params):
    hp = lax.Precision.HIGHEST
    lq, n, _ = x1.shape
    lk = x2.shape[0]
    in_w, in_b = params["in_proj_weight"], params["in_proj_bias"]
    out_w, out_b = params["out_proj_weight"], params["out_proj_bias"]
    q = jnp.dot(x1, in_w[:E].T, precision=hp) + in_b[:E]
    k = jnp.dot(x2, in_w[E:2 * E].T, precision=hp) + in_b[E:2 * E]
    v = jnp.dot(x2, in_w[2 * E:].T, precision=hp) + in_b[2 * E:]
    q = q.reshape(lq, n * H, DH).transpose(1, 0, 2)
    k = k.reshape(lk, n * H, DH).transpose(1, 0, 2)
    v = v.reshape(lk, n * H, DH).transpose(1, 0, 2)
    s = jnp.einsum("bqd,bkd->bqk", q, k, precision=hp) / math.sqrt(DH)
    p = jax.nn.softmax(s, axis=-1)
    o = jnp.einsum("bqk,bkd->bqd", p, v, precision=hp)
    o = o.transpose(1, 0, 2).reshape(lq * n, E)
    return (jnp.dot(o, out_w.T, precision=hp) + out_b).reshape(lq, n, E)


def init_params(key):
    k1, k2 = jax.random.split(key, 2)
    bound_in = math.sqrt(6.0 / (E + E))
    in_proj_weight = jax.random.uniform(
        k1, (3 * E, E), jnp.float32, -bound_in, bound_in)
    in_proj_bias = jnp.zeros((3 * E,), jnp.float32)
    bound_out = 1.0 / math.sqrt(E)
    out_proj_weight = jax.random.uniform(
        k2, (E, E), jnp.float32, -bound_out, bound_out)
    out_proj_bias = jnp.zeros((E,), jnp.float32)
    return {
        "in_proj_weight": in_proj_weight,
        "in_proj_bias": in_proj_bias,
        "out_proj_weight": out_proj_weight,
        "out_proj_bias": out_proj_bias,
    }


if __name__ == "__main__":
    key = jax.random.PRNGKey(0)
    kp, kx1, kx2 = jax.random.split(key, 3)

    params = init_params(kp)

    # MultiheadAttention(64, 4) forward shapes: (L, N, E) with E = 64.
    # Lq=4, Lk=28 echo the 4/28 dims of the original module's example tensors
    # and exercise the padding + key-masking path; N=2 exercises the batch grid.
    Lq, Lk, N = 4, 28, 2
    x1 = jax.random.normal(kx1, (Lq, N, E), jnp.float32)   # query
    x2 = jax.random.normal(kx2, (Lk, N, E), jnp.float32)   # key = value

    out = multihead_attention(x1, x2, params)
    out = jax.block_until_ready(out)

    ref = multihead_attention_ref(x1, x2, params)
    assert out.shape == (Lq, N, E)
    err = float(jnp.max(jnp.abs(out - ref)))
    assert jnp.allclose(out, ref, atol=2e-4, rtol=2e-4), f"max abs err = {err}"

    print("KERNEL_OK")
</pallas_src>

<mosaic_0001>
module attributes {stable_mosaic.version = 11 : i64} {
  func.func @_mha_kernel(%arg0: i32, %arg1: memref<1x8x64xf32, #tpu.memory_space<vmem>>, %arg2: memref<1x32x64xf32, #tpu.memory_space<vmem>>, %arg3: memref<64x64xf32, #tpu.memory_space<vmem>>, %arg4: memref<64x128xf32, #tpu.memory_space<vmem>>, %arg5: memref<1x64xf32, #tpu.memory_space<vmem>>, %arg6: memref<1x128xf32, #tpu.memory_space<vmem>>, %arg7: memref<64x64xf32, #tpu.memory_space<vmem>>, %arg8: memref<1x64xf32, #tpu.memory_space<vmem>>, %arg9: memref<1x4x64xf32, #tpu.memory_space<vmem>>) attributes {dimension_semantics = [#tpu.dimension_semantics<parallel>], iteration_bounds = array<i64: 2>, scalar_prefetch = 0 : i64, scratch_operands = 0 : i64, tpu.core_type = #tpu.core_type<tc>, window_params = [{transform_indices = @transform_0, window_bounds = array<i64: 1, 8, 64>}, {transform_indices = @transform_1, window_bounds = array<i64: 1, 32, 64>}, {pipeline_mode = #tpu.pipeline_mode<synchronous>, transform_indices = @transform_2, window_bounds = array<i64: 64, 64>}, {pipeline_mode = #tpu.pipeline_mode<synchronous>, transform_indices = @transform_3, window_bounds = array<i64: 64, 128>}, {pipeline_mode = #tpu.pipeline_mode<synchronous>, transform_indices = @transform_4, window_bounds = array<i64: 1, 64>}, {pipeline_mode = #tpu.pipeline_mode<synchronous>, transform_indices = @transform_5, window_bounds = array<i64: 1, 128>}, {pipeline_mode = #tpu.pipeline_mode<synchronous>, transform_indices = @transform_6, window_bounds = array<i64: 64, 64>}, {pipeline_mode = #tpu.pipeline_mode<synchronous>, transform_indices = @transform_7, window_bounds = array<i64: 1, 64>}, {transform_indices = @transform_8, window_bounds = array<i64: 1, 4, 64>}]} {
    %c0 = arith.constant 0 : index
    %c0_0 = arith.constant 0 : index
    %c0_1 = arith.constant 0 : index
    %0 = vector.load %arg1[%c0, %c0_0, %c0_1] : memref<1x8x64xf32, #tpu.memory_space<vmem>>, vector<1x8x64xf32>
    %1 = vector.shape_cast %0 : vector<1x8x64xf32> to vector<8x64xf32>
    %c0_2 = arith.constant 0 : index
    %c0_3 = arith.constant 0 : index
    %c0_4 = arith.constant 0 : index
    %2 = vector.load %arg2[%c0_2, %c0_3, %c0_4] : memref<1x32x64xf32, #tpu.memory_space<vmem>>, vector<1x32x64xf32>
    %3 = vector.shape_cast %2 : vector<1x32x64xf32> to vector<32x64xf32>
    %c0_5 = arith.constant 0 : index
    %c0_6 = arith.constant 0 : index
    %4 = vector.load %arg3[%c0_5, %c0_6] : memref<64x64xf32, #tpu.memory_space<vmem>>, vector<64x64xf32>
    %cst = arith.constant dense<0.000000e+00> : vector<8x64xf32>
    %5 = tpu.matmul %1, %4, %cst {dimension_numbers = #tpu.dot_dimension_numbers<[1], [0], [0], [1], [0, 0, 1, 1], [], []>} : vector<8x64xf32>, vector<64x64xf32>, vector<8x64xf32> -> vector<8x64xf32>
    %c0_7 = arith.constant 0 : index
    %c0_8 = arith.constant 0 : index
    %6 = vector.load %arg5[%c0_7, %c0_8] : memref<1x64xf32, #tpu.memory_space<vmem>>, vector<1x64xf32>
    %7 = vector.broadcast %6 : vector<1x64xf32> to vector<8x64xf32>
    %8 = arith.addf %5, %7 : vector<8x64xf32>
    %c0_9 = arith.constant 0 : index
    %c0_10 = arith.constant 0 : index
    %9 = vector.load %arg4[%c0_9, %c0_10] : memref<64x128xf32, #tpu.memory_space<vmem>>, vector<64x128xf32>
    %cst_11 = arith.constant dense<0.000000e+00> : vector<32x128xf32>
    %10 = tpu.matmul %3, %9, %cst_11 {dimension_numbers = #tpu.dot_dimension_numbers<[1], [0], [0], [1], [0, 0, 1, 1], [], []>} : vector<32x64xf32>, vector<64x128xf32>, vector<32x128xf32> -> vector<32x128xf32>
    %c0_12 = arith.constant 0 : index
    %c0_13 = arith.constant 0 : index
    %11 = vector.load %arg6[%c0_12, %c0_13] : memref<1x128xf32, #tpu.memory_space<vmem>>, vector<1x128xf32>
    %12 = vector.broadcast %11 : vector<1x128xf32> to vector<32x128xf32>
    %13 = arith.addf %10, %12 : vector<32x128xf32>
    %14 = vector.shape_cast %8 : vector<8x64xf32> to vector<8x4x16xf32>
    %15 = tpu.transpose %14, [1, 0, 2] : vector<8x4x16xf32> -> vector<4x8x16xf32>
    %16 = vector.shape_cast %13 : vector<32x128xf32> to vector<32x8x16xf32>
    %17 = tpu.transpose %16, [1, 0, 2] : vector<32x8x16xf32> -> vector<8x32x16xf32>
    %18 = vector.extract_strided_slice %17 {offsets = [0, 0, 0], sizes = [4, 32, 16], strides = [1, 1, 1]} : vector<8x32x16xf32> to vector<4x32x16xf32>
    %19 = vector.extract_strided_slice %17 {offsets = [4, 0, 0], sizes = [4, 32, 16], strides = [1, 1, 1]} : vector<8x32x16xf32> to vector<4x32x16xf32>
    "tpu.trace_start"() <{level = 10 : i32, message = "hqd,hkd->hqk"}> : () -> ()
    %cst_14 = arith.constant dense<0.000000e+00> : vector<4x8x32xf32>
    %20 = tpu.matmul %15, %18, %cst_14 {dimension_numbers = #tpu.dot_dimension_numbers<[2], [2], [1], [1], [0, 0, 0, 1, 1, 1], [0], [0]>} : vector<4x8x16xf32>, vector<4x32x16xf32>, vector<4x8x32xf32> -> vector<4x8x32xf32>
    "tpu.trace_stop"() : () -> ()
    %21 = tpu.iota {dimensions = array<i32: 2>} : vector<4x8x32xi32>
    %c28_i32 = arith.constant 28 : i32
    %22 = vector.broadcast %c28_i32 : i32 to vector<4x8x32xi32>
    %23 = arith.cmpi slt, %21, %22 : vector<4x8x32xi32>
    %cst_15 = arith.constant -1.000000e+30 : f32
    %24 = vector.broadcast %cst_15 : f32 to vector<4x8x32xf32>
    %25 = arith.select %23, %20, %24 : vector<4x8x32xi1>, vector<4x8x32xf32>
    %cst_16 = arith.constant dense<0xFF800000> : vector<4x8xf32>
    %26 = vector.multi_reduction <maximumf>, %25, %cst_16 [2] : vector<4x8x32xf32> to vector<4x8xf32>
    %27 = vector.shape_cast %26 : vector<4x8xf32> to vector<4x8x1xf32>
    %28 = vector.broadcast %27 : vector<4x8x1xf32> to vector<4x8x32xf32>
    %29 = arith.subf %25, %28 : vector<4x8x32xf32>
    %30 = math.exp %29 : vector<4x8x32xf32>
    %cst_17 = arith.constant dense<0.000000e+00> : vector<4x8xf32>
    %31 = vector.multi_reduction <add>, %30, %cst_17 [2] : vector<4x8x32xf32> to vector<4x8xf32>
    %32 = vector.shape_cast %31 : vector<4x8xf32> to vector<4x8x1xf32>
    %33 = tpu.reciprocal %32 {approx = true} : vector<4x8x1xf32> -> vector<4x8x1xf32>
    %34 = arith.mulf %32, %33 : vector<4x8x1xf32>
    %cst_18 = arith.constant 2.000000e+00 : f32
    %35 = vector.broadcast %cst_18 : f32 to vector<4x8x1xf32>
    %36 = arith.subf %35, %34 : vector<4x8x1xf32>
    %37 = arith.mulf %33, %36 : vector<4x8x1xf32>
    %38 = vector.broadcast %37 : vector<4x8x1xf32> to vector<4x8x32xf32>
    %39 = arith.mulf %30, %38 : vector<4x8x32xf32>
    "tpu.trace_start"() <{level = 10 : i32, message = "hqk,hkd->hqd"}> : () -> ()
    %cst_19 = arith.constant dense<0.000000e+00> : vector<4x8x16xf32>
    %40 = tpu.matmul %39, %19, %cst_19 {dimension_numbers = #tpu.dot_dimension_numbers<[2], [1], [1], [2], [0, 0, 0, 1, 1, 2], [0], [0]>} : vector<4x8x32xf32>, vector<4x32x16xf32>, vector<4x8x16xf32> -> vector<4x8x16xf32>
    "tpu.trace_stop"() : () -> ()
    %41 = tpu.transpose %40, [1, 0, 2] : vector<4x8x16xf32> -> vector<8x4x16xf32>
    %42 = vector.shape_cast %41 : vector<8x4x16xf32> to vector<8x64xf32>
    %c0_20 = arith.constant 0 : index
    %c0_21 = arith.constant 0 : index
    %43 = vector.load %arg7[%c0_20, %c0_21] : memref<64x64xf32, #tpu.memory_space<vmem>>, vector<64x64xf32>
    %cst_22 = arith.constant dense<0.000000e+00> : vector<8x64xf32>
    %44 = tpu.matmul %42, %43, %cst_22 {dimension_numbers = #tpu.dot_dimension_numbers<[1], [0], [0], [1], [0, 0, 1, 1], [], []>} : vector<8x64xf32>, vector<64x64xf32>, vector<8x64xf32> -> vector<8x64xf32>
    %c0_23 = arith.constant 0 : index
    %c0_24 = arith.constant 0 : index
    %45 = vector.load %arg8[%c0_23, %c0_24] : memref<1x64xf32, #tpu.memory_space<vmem>>, vector<1x64xf32>
    %46 = vector.broadcast %45 : vector<1x64xf32> to vector<8x64xf32>
    %47 = arith.addf %44, %46 : vector<8x64xf32>
    %48 = vector.extract_strided_slice %47 {offsets = [0, 0], sizes = [4, 64], strides = [1, 1]} : vector<8x64xf32> to vector<4x64xf32>
    %c0_25 = arith.constant 0 : index
    %c0_26 = arith.constant 0 : index
    %c0_27 = arith.constant 0 : index
    %49 = vector.load %arg9[%c0_25, %c0_26, %c0_27] : memref<1x4x64xf32, #tpu.memory_space<vmem>>, vector<1x4x64xf32>
    %50 = vector.shape_cast %49 : vector<1x4x64xf32> to vector<4x64xf32>
    %51 = vector.shape_cast %48 : vector<4x64xf32> to vector<1x4x64xf32>
    tpu.vector_store %arg9[%c0_25, %c0_26, %c0_27], %51 {strides = array<i32>} : memref<1x4x64xf32, #tpu.memory_space<vmem>>, vector<1x4x64xf32>,
    return
  }
  func.func @transform_0(%arg0: i32) -> (i32, i32, i32) {
    %c0_i32 = arith.constant 0 : i32
    %c0_i32_0 = arith.constant 0 : i32
    %c0_i32_1 = arith.constant 0 : i32
    return %arg0, %c0_i32, %c0_i32_0 : i32, i32, i32
  }
  func.func @transform_1(%arg0: i32) -> (i32, i32, i32) {
    %c0_i32 = arith.constant 0 : i32
    %c0_i32_0 = arith.constant 0 : i32
    %c0_i32_1 = arith.constant 0 : i32
    return %arg0, %c0_i32, %c0_i32_0 : i32, i32, i32
  }
  func.func @transform_2(%arg0: i32) -> (i32, i32) {
    %c0_i32 = arith.constant 0 : i32
    %c0_i32_0 = arith.constant 0 : i32
    %c0_i32_1 = arith.constant 0 : i32
    return %c0_i32, %c0_i32_0 : i32, i32
  }
  func.func @transform_3(%arg0: i32) -> (i32, i32) {
    %c0_i32 = arith.constant 0 : i32
    %c0_i32_0 = arith.constant 0 : i32
    %c0_i32_1 = arith.constant 0 : i32
    return %c0_i32, %c0_i32_0 : i32, i32
  }
  func.func @transform_4(%arg0: i32) -> (i32, i32) {
    %c0_i32 = arith.constant 0 : i32
    %c0_i32_0 = arith.constant 0 : i32
    %c0_i32_1 = arith.constant 0 : i32
    return %c0_i32, %c0_i32_0 : i32, i32
  }
  func.func @transform_5(%arg0: i32) -> (i32, i32) {
    %c0_i32 = arith.constant 0 : i32
    %c0_i32_0 = arith.constant 0 : i32
    %c0_i32_1 = arith.constant 0 : i32
    return %c0_i32, %c0_i32_0 : i32, i32
  }
  func.func @transform_6(%arg0: i32) -> (i32, i32) {
    %c0_i32 = arith.constant 0 : i32
    %c0_i32_0 = arith.constant 0 : i32
    %c0_i32_1 = arith.constant 0 : i32
    return %c0_i32, %c0_i32_0 : i32, i32
  }
  func.func @transform_7(%arg0: i32) -> (i32, i32) {
    %c0_i32 = arith.constant 0 : i32
    %c0_i32_0 = arith.constant 0 : i32
    %c0_i32_1 = arith.constant 0 : i32
    return %c0_i32, %c0_i32_0 : i32, i32
  }
  func.func @transform_8(%arg0: i32) -> (i32, i32, i32) {
    %c0_i32 = arith.constant 0 : i32
    %c0_i32_0 = arith.constant 0 : i32
    %c0_i32_1 = arith.constant 0 : i32
    return %arg0, %c0_i32, %c0_i32_0 : i32, i32, i32
  }
}

</mosaic_0001>

<bundles_post_ra>
// kernel: tpu_custom_call.1
= control target key start
LH: loop header
LB: loop body
LE: loop exit
PB: predicated region body
PF: predicated region fallthrough
CT: control target
= control target key end

     0   :  { %s4620_s0 = inlined_call_operand.hbm [shape: f32[2,8,64], index: 0, kind: input, shape index: {}]   ;;  %s4621_s1 = inlined_call_operand.hbm [shape: f32[2,32,64], index: 1, kind: input, shape index: {}]   ;;  %s4622_s2 = inlined_call_operand.hbm [shape: f32[64,64], index: 2, kind: input, shape index: {}]   ;;  %s4623_s3 = inlined_call_operand.hbm [shape: f32[64,128], index: 3, kind: input, shape index: {}]   ;;  %s4624_s4 = inlined_call_operand.vmem [shape: f32[1,64], index: 4, kind: input, shape index: {}]   ;;  %s4625_s5 = inlined_call_operand.vmem [shape: f32[1,128], index: 5, kind: input, shape index: {}]   ;;  %s4626_s6 = inlined_call_operand.hbm [shape: f32[64,64], index: 6, kind: input, shape index: {}]   ;;  %s4627_s7 = inlined_call_operand.vmem [shape: f32[1,64], index: 7, kind: input, shape index: {}]   ;;  %s4628_s8 = inlined_call_operand.hbm [shape: f32[2,4,64], index: 8, kind: output, shape index: {}]  }
   0x1   :  { %4636 = sst [smem:[#allocation19_spill]] %s4620_s0 }
   0x2   :  { %4637 = sst [smem:[#allocation20_spill]] %s4622_s2 }
   0x3   :  { %13 = vsyncpa [#allocation3], 0 }
   0x4   :  { %15 = vsyncpa [#allocation3 + $0x1], 0 }
   0x5   :  { %16 = vsyncpa [#allocation6], 0 }
   0x6   :  { %18 = vsyncpa [#allocation6 + $0x1], 0 }
   0x7   :  { %19 = vsyncpa [#allocation9], 0 }
   0x8   :  { %20 = vsyncpa [#allocation4], 0 }
   0x9   :  { %22 = vsyncpa [#allocation4 + $0x1], 0  ;;  %s3813_s27 = smov 0   ;;  %s3815_s28 = smov 0  }
   0xa   :  { %s3817_s29 = smov 0   ;;  %s3819_s30 = smov 0  }
   0xb LB: > { %4638 = sst [smem:[#allocation17_spill]] %s3734_s27  ;;  %s3834_s9 = sadd.s32 4294967295, %s3746_s30   ;;  %s3746_s30 = sphi %s3819_s30, %s4667_s30   ;;  %s3742_s29 = sphi %s3817_s29, %s4666_s29   ;;  %s3738_s28 = sphi %s3815_s28, %s4665_s28   ;;  %s3734_s27 = sphi %s3813_s27, %s4664_s27  }
   0xc   : > { %s3006_s10 = sadd.s32 4294967294, %s3746_s30   ;;  %p48_p0 = scmp.ne.s32.totalorder %s3738_s28, %s3734_s27 }
   0xd   : > { %p4629_p1 = scmp.eq.s32.totalorder %s3834_s9, 0  ;;  %p230_p3 = scmp.eq.s32.totalorder %s3006_s10, 1 }
   0xe   : > { %p3007_p5 = scmp.ge.s32.totalorder %s3746_s30, 1  ;;  %p237_p7 = scmp.lt.s32.totalorder %s3746_s30, 3 }
   0xf   : > { %p3843_p4 = por %p4629_p1, %p48_p0  ;;  %p3848_p6 = por %p230_p3, %p48_p0 }
  0x10   : > { %p3853_p8 = pnand %p3007_p5, %p237_p7  ;;  %s3748_s14 = smov [#allocation7]  }
  0x11   : > { %s4639_s11 = scalar_select %p3843_p4, 1, 0 }
  0x12   : > { %s4640_s12 = scalar_select %p3848_p6, 1, 0 }
  0x13   : > { %s4642_s13 = scalar_select %p3853_p8, 1, 0 }
  0x14   : > { %4641 = sst [smem:[#allocation18_spill]] %s4640_s12  ;;  %s249_s15 = sshll.u32 %s3748_s14, 4  ;;  %s3857_s15 = int_to_ptr.vmem [resolvable:$true] %s249_s15 }
  0x15   : > { %p3430_p9 = pneg %p3853_p8  ;;  %s3749_s17 = smov [#allocation8]  }
  0x16   : > { %s262_s18 = sshll.u32 %s3749_s17, 4  ;;  %s3750_s19 = smov [#allocation10]   ;;  %s3868_s18 = int_to_ptr.vmem [resolvable:$true] %s262_s18 }
  0x17   : > { %p3864_p11 = pnand %p3430_p9, %p4629_p1  ;;  %s3870_s20 = sshll.u32 %s3750_s19, 4  ;;  %s282_s20 = int_to_ptr.vmem [resolvable:$true] %s3870_s20 }
  0x18   : > { %s4644_s2 = sld [smem:[#allocation20_spill]] }
  0x19   : > { %p3880_p13 = pneg %p3864_p11 }
  0x1e   : > { %s3524_s23 = scalar_lea.hbm %s4644_s2, 1024 }
  0x1f   : > { %p3525_p12 = scmp.ne.s32.totalorder %s4644_s2, %s3524_s23  ;;  %p3531_p5 = scmp.lt.u32.totalorder %s3524_s23, %s4644_s2 }
  0x21   : > { %p3527_p0 = pnand %p3880_p13, %p3525_p12 }
  0x23   : > { %p3528_p3 = pneg %p3527_p0 }
  0x25   : > { %p3533_p7 = pnand %p3531_p5, %p3528_p3 }
  0x27   : > { %3536 = shalt.err (!%p3533_p7)
}
  0x28   : > { %s3537_s17 = scalar_lea.vmem %s3857_s15, 1024  ;;  %p3545_p2 = scmp.lt.s32.totalorder %s3857_s15, %s3857_s15 }
  0x29   : > { %p3538_p9 = scmp.ne.s32.totalorder %s3857_s15, %s3537_s17  ;;  %p3546_p6 = scmp.lt.s32.totalorder %s3537_s17, %s3537_s17 }
  0x2b   : > { %p3540_p10 = pnand %p3538_p9, %p3880_p13  ;;  %p3547_p12 = por %p3546_p6, %p3545_p2 }
  0x2d   : > { %p3541_p1 = pneg %p3540_p10 }
  0x2f   : > { %p3548_p0 = pnand %p3547_p12, %p3541_p1 }
  0x31   : > { %3551 = shalt.err (!%p3548_p0)
}
  0x32   : > { %s4634_s19 = smov 128   ;;  %s4635_s21 = smov 8  }
  0x33   : > { %3433 = dma.hbm_to_vmem [thread:$0]  (!%p3864_p11), %s4644_s2, 1024, %s3857_s15, [#allocation6], %s4634_s19, %s4634_s19, %s4635_s21  }
  0x34   : > { %s3552_s10 = scalar_lea.hbm %s4623_s3, 1024 }
  0x35   : > { %p3553_p1 = scmp.ne.s32.totalorder %s4623_s3, %s3552_s10  ;;  %p3559_p10 = scmp.lt.u32.totalorder %s3552_s10, %s4623_s3 }
  0x37   : > { %p3555_p2 = pnand %p3553_p1, %p3880_p13 }
  0x39   : > { %p3556_p6 = pneg %p3555_p2 }
  0x3b   : > { %p3561_p3 = pnand %p3559_p10, %p3556_p6 }
  0x3d   : > { %3564 = shalt.err (!%p3561_p3)
}
  0x3e   : > { %s3565_s15 = scalar_lea.vmem %s3868_s18, 1024  ;;  %p3573_p12 = scmp.lt.s32.totalorder %s3868_s18, %s3868_s18 }
  0x3f   : > { %p3566_p5 = scmp.ne.s32.totalorder %s3868_s18, %s3565_s15  ;;  %p3574_p0 = scmp.lt.s32.totalorder %s3565_s15, %s3565_s15 }
  0x41   : > { %p3568_p7 = pnand %p3566_p5, %p3880_p13  ;;  %p3575_p1 = por %p3574_p0, %p3573_p12 }
  0x43   : > { %p3569_p9 = pneg %p3568_p7 }
  0x45   : > { %p3576_p2 = pnand %p3575_p1, %p3569_p9 }
  0x47   : > { %3579 = shalt.err (!%p3576_p2)
}
  0x48   : > { %3436 = dma.hbm_to_vmem [thread:$0]  (!%p3864_p11), %s4623_s3, 1024, %s3868_s18, [#allocation9], %s4634_s19, %s4634_s19, %s4635_s21  }
  0x49   : > { %s3580_s24 = scalar_lea.hbm %s4626_s6, 1024 }
  0x4a   : > { %p3581_p6 = scmp.ne.s32.totalorder %s4626_s6, %s3580_s24  ;;  %p3587_p5 = scmp.lt.u32.totalorder %s3580_s24, %s4626_s6 }
  0x4c   : > { %p3583_p10 = pnand %p3581_p6, %p3880_p13 }
  0x4e   : > { %p3584_p3 = pneg %p3583_p10 }
  0x50   : > { %p3589_p7 = pnand %p3587_p5, %p3584_p3 }
  0x52   : > { %3592 = shalt.err (!%p3589_p7)
}
  0x53   : > { %s3593_s15 = scalar_lea.vmem %s282_s20, 1024  ;;  %p3601_p1 = scmp.lt.s32.totalorder %s282_s20, %s282_s20 }
  0x54   : > { %p3594_p9 = scmp.ne.s32.totalorder %s282_s20, %s3593_s15  ;;  %p3602_p2 = scmp.lt.s32.totalorder %s3593_s15, %s3593_s15 }
  0x56   : > { %p3596_p12 = pnand %p3594_p9, %p3880_p13  ;;  %p3603_p4 = por %p3602_p2, %p3601_p1 }
  0x58   : > { %p3597_p0 = pneg %p3596_p12 }
  0x5a   : > { %p3604_p8 = pnand %p3603_p4, %p3597_p0 }
  0x5c   : > { %3607 = shalt.err (!%p3604_p8)
}
  0x5d   : > { %3439 = dma.hbm_to_vmem [thread:$0]  (!%p3864_p11), %s4626_s6, 1024, %s282_s20, [#allocation9], %s4634_s19, %s4634_s19, %s4635_s21  }
  0x5e   : > { %s3953_s26 = sadd.s32 1, %s3746_s30   ;;  %s35_s12 = sadd.s32 1, %s3742_s29 }
  0x5f   : > { %s32_s16 = ssub.s32 %s3746_s30, %s3953_s26  ;;  %p42_p8 = scmp.ne.s32.totalorder %s3742_s29, %s3738_s28 }
  0x60   : > { %p33_p4 = scmp.eq.s32.totalorder %s32_s16, 0  ;;  %p43_p13 = scmp.eq.s32.totalorder %s3746_s30, 0 }
  0x61   : > { %p3454_p6 = scmp.lt.s32.totalorder %s3746_s30, 2  ;;  %p4646_p3 = scmp.eq.s32.totalorder %s3834_s9, 1 }
  0x62   : > { %s3963_s22 = scalar_select %p33_p4, %s3742_s29, %s35_s12  }
  0x63   : > { %p44_p10 = por %p43_p13, %p42_p8  ;;  %p3967_p5 = por %p4646_p3, %p42_p8 }
  0x64   : > { %s3972_s24 = sand.u32 1, %s3742_s29   ;;  %s3013_s20 = sshll.u32 %s3746_s30, 7 }
  0x65   : > { %s3012_s25 = sshll.u32 %s3972_s24, 3  ;;  %s4648_s0 = sld [smem:[#allocation19_spill]] }
  0x66   : > { %s302_s15 = scalar_lea.vmem [#allocation2], %s3012_s25  ;;  %p3981_p11 = pnand %p3454_p6, %p44_p10 }
  0x67   : > { %s309_s18 = sshll.u32 %s302_s15, 4  ;;  %s3014_s16 = sshll.u32 %s3972_s24, 5  ;;  %s3985_s18 = int_to_ptr.vmem [resolvable:$true] %s309_s18 }
  0x68   : > { %s299_s12 = scalar_lea.sflag [#allocation3], %s3972_s24  ;;  %p3610_p9 = pneg %p3981_p11 }
  0x6b   : > { %s3979_s17 = scalar_lea.hbm %s4648_s0, %s3013_s20  ;;  %s3613_s10 = scalar_lea.hbm %s4648_s0, 256 }
  0x6c   : > { %s3608_s19 = scalar_lea.hbm %s3979_s17, 128  ;;  %p3614_p1 = scmp.lt.u32.totalorder %s3979_s17, %s4648_s0 }
  0x6d   : > { %p3609_p7 = scmp.ne.s32.totalorder %s3979_s17, %s3608_s19  ;;  %p3615_p2 = scmp.lt.u32.totalorder %s3613_s10, %s3608_s19 }
  0x6e   : > { %p3617_p8 = scmp.lt.u32.totalorder %s3608_s19, %s3979_s17 }
  0x6f   : > { %p3611_p12 = pnand %p3610_p9, %p3609_p7  ;;  %p3616_p4 = por %p3615_p2, %p3614_p1 }
  0x71   : > { %p3612_p0 = pneg %p3611_p12  ;;  %p3618_p13 = por %p3617_p8, %p3616_p4 }
  0x73   : > { %p3619_p6 = pnand %p3618_p13, %p3612_p0 }
  0x75   : > { %3622 = shalt.err (!%p3619_p6)
}
  0x76   : > { %s3623_s21 = scalar_lea.vmem %s3985_s18, 128  ;;  %s3753_s20 = smov [#allocation2]  }
  0x77   : > { %p3624_p10 = scmp.ne.s32.totalorder %s3985_s18, %s3623_s21  ;;  %s3628_s25 = sshll.u32 %s3753_s20, 4  ;;  %s3629_s25 = int_to_ptr.vmem [resolvable:$false] %s3628_s25 }
  0x78   : > { %s3630_s14 = scalar_lea.vmem %s3629_s25, 256  ;;  %p3631_p12 = scmp.lt.s32.totalorder %s3985_s18, %s3629_s25 }
  0x79   : > { %p3626_p3 = pnand %p3624_p10, %p3610_p9  ;;  %p3632_p1 = scmp.lt.s32.totalorder %s3630_s14, %s3623_s21 }
  0x7b   : > { %p3627_p7 = pneg %p3626_p3  ;;  %p3633_p2 = por %p3632_p1, %p3631_p12 }
  0x7d   : > { %p3634_p4 = pnand %p3633_p2, %p3627_p7 }
  0x7f   : > { %3637 = shalt.err (!%p3634_p4)
}
  0x80   : > { %3443 = dma.hbm_to_vmem [thread:$0]  (!%p3981_p11), %s3979_s17, 128, %s3985_s18, %s299_s12  }
  0x81   : > { %s320_s19 = scalar_lea.vmem [#allocation5], %s3014_s16  ;;  %s316_s15 = sand.u32 1, %s3746_s30  }
  0x82   : > { %s327_s10 = sshll.u32 %s320_s19, 4  ;;  %s3097_s20 = sshll.u32 %s3746_s30, 9  ;;  %s4017_s10 = int_to_ptr.vmem [resolvable:$true] %s327_s10 }
  0x83   : > { %s4023_s14 = scalar_lea.hbm %s4621_s1, %s3097_s20  ;;  %s4025_s0 = scalar_lea.sflag [#allocation6], %s316_s15 }
  0x84   : > { %s3638_s2 = scalar_lea.hbm %s4023_s14, 512  ;;  %s3643_s18 = scalar_lea.hbm %s4621_s1, 1024 }
  0x85   : > { %p3639_p0 = scmp.ne.s32.totalorder %s4023_s14, %s3638_s2  ;;  %p3644_p6 = scmp.lt.u32.totalorder %s4023_s14, %s4621_s1 }
  0x86   : > { %p3645_p10 = scmp.lt.u32.totalorder %s3643_s18, %s3638_s2  ;;  %p3647_p7 = scmp.lt.u32.totalorder %s3638_s2, %s4023_s14 }
  0x87   : > { %p3641_p8 = pnand %p3639_p0, %p3610_p9 }
  0x88   : > { %p3646_p3 = por %p3645_p10, %p3644_p6 }
  0x89   : > { %p3642_p13 = pneg %p3641_p8 }
  0x8a   : > { %p3648_p12 = por %p3647_p7, %p3646_p3 }
  0x8c   : > { %p3649_p1 = pnand %p3648_p12, %p3642_p13 }
  0x8e   : > { %3652 = shalt.err (!%p3649_p1)
}
  0x8f   : > { %s3653_s19 = scalar_lea.vmem %s4017_s10, 512  ;;  %s3754_s15 = smov [#allocation5]  }
  0x90   : > { %p3654_p2 = scmp.ne.s32.totalorder %s4017_s10, %s3653_s19  ;;  %s3658_s20 = sshll.u32 %s3754_s15, 4  ;;  %s3659_s20 = int_to_ptr.vmem [resolvable:$false] %s3658_s20 }
  0x91   : > { %s3660_s21 = scalar_lea.vmem %s3659_s20, 1024  ;;  %p3661_p8 = scmp.lt.s32.totalorder %s4017_s10, %s3659_s20 }
  0x92   : > { %p3656_p4 = pnand %p3654_p2, %p3610_p9  ;;  %p3662_p6 = scmp.lt.s32.totalorder %s3660_s21, %s3653_s19 }
  0x94   : > { %p3657_p0 = pneg %p3656_p4  ;;  %p3663_p10 = por %p3662_p6, %p3661_p8 }
  0x96   : > { %p3664_p3 = pnand %p3663_p10, %p3657_p0 }
  0x98   : > { %3667 = shalt.err (!%p3664_p3)
}
  0x99   : > { %s4650_s2 = smov 8   ;;  %s4651_s25 = smov 128  }
  0x9a   : > { %3446 = dma.hbm_to_vmem [thread:$0]  (!%p3981_p11), %s4023_s14, 512, %s4017_s10, %s4025_s0, %s4651_s25, %s4651_s25, %s4650_s2  }
  0x9b   : > { %p4652_p9 = scmp.ne.s32.totalorder %s4642_s13, 0 }
  0x9c   : > { %s4057_s24 = sand.u32 (!%p4652_p9), 1, %s3738_s28   ;;  %p4653_p13 = scmp.ne.s32.totalorder (!%p4652_p9), %s4639_s11, 0 }
  0x9d   : > { %339 = sbr.rel (%p4652_p9) target bundleno = 1754 (0x6da), region = 52  ;;  %s3018_s17 = sshll.u32 (!%p4652_p9), %s4057_s24, 3 }
  0x9e   : > { %s342_s18 = scalar_lea.sflag (!%p4652_p9), [#allocation3], %s4057_s24  ;;  %s4061_s16 = scalar_lea.vmem (!%p4652_p9), [#allocation2], %s3018_s17 }
  0xa4   : > { %3713 = dma.done.wait (%p4653_p13), %s342_s18, 128  }
  0xa5   : > { %3715 = vsyncadd (%p4653_p13), %s342_s18, 4294967168  ;;  %s350_s0 = sand.u32 1, %s3834_s9   ;;  %s3019_s13 = sshll.u32 %s4057_s24, 5 }
  0xa6   : > { %s351_s27 = scalar_lea.sflag [#allocation6], %s350_s0  ;;  %s4069_s10 = scalar_lea.vmem [#allocation5], %s3019_s13 }
  0xa7   : > { %3717 = dma.done.wait (%p4653_p13), %s351_s27, 512  }
  0xa8   : > { %3719 = vsyncadd (%p4653_p13), %s351_s27, 4294966784  ;;  %p4654_p11 = scmp.eq.s32.totalorder %s3834_s9, 0 }
  0xaa   : > { %3721 = dma.done.wait (%p4654_p11), [#allocation6], 1024   ;;  %p4655_p7 = pmov %p4654_p11 }
  0xac   : > { %3723 = vsyncadd (%p4655_p7), [#allocation6], 4294966272  ;;  %p4656_p12 = pmov %p4655_p7 }
  0xad   : > { %p4657_p1 = pmov %p4655_p7 }
  0xae   : > { %3725 = dma.done.wait (%p4656_p12), [#allocation9], 2048  }
  0xaf   : > { %3727 = vsyncadd (%p4657_p1), [#allocation9], 4294965248  ;;  %v3755_v0 = vmov 0.0|0.0   ;;  %vm3756_vm0 = vmmov 0   ;;  %v3757_v1 = vmov 0.0   ;;  %v498_v2 = vld [vmem:[#allocation8] sm:$0xff]  ;;  %v625_v46 = vlaneseq }
  0xb0   : > { %3316 = vmatprep.subr.bf16.mxu0 %v3755_v0  ;;  %3184 = vmatprep.mubr.msk.f32.mxu0 %vm3756_vm0, %v3757_v1  ;;  %v499_v3 = vld [vmem:[#allocation8 + $0x8] sm:$0xff]  ;;  %v500_v4 = vld [vmem:[#allocation8 + $0x10] sm:$0xff]  ;;  %vm424_vm1 = vcmask 523264   ;;  %v501_v6 = vld [vmem:[#allocation8 + $0x18] sm:$0xff]  ;;  %s3758_s12 = smov 96   ;;  %s3759_s19 = smov 112  }
  0xb1   : > { %v3328_v5 = vpack.c.bf16 %v499_v3, %v498_v2  ;;  %v3332_v7 = vpack.c.bf16 %v501_v6, %v500_v4  ;;  %v502_v8 = vld [vmem:[#allocation8 + $0x20] sm:$0xff]  ;;  %v503_v9 = vld [vmem:[#allocation8 + $0x28] sm:$0xff]  ;;  %v411_v14 = vld [vmem:[#allocation7 + $0x10] sm:$0xff]  ;;  %s3760_s15 = smov 80   ;;  %s3761_s2 = smov 64   ;;  %v626_v50 = vshrl.u32 %v625_v46, 7 }
  0xb2   : > { %v405_v10 = vld [vmem:[%s4069_s10] sm:$0xff]  ;;  %v410_v12 = vld [vmem:[#allocation7 + $0x8] sm:$0xff]  ;;  %v3336_v15 = vpack.c.bf16 %v503_v9, %v502_v8  ;;  %v412_v16 = vld [vmem:[#allocation7 + $0x18] sm:$0xff]  ;;  %s3762_s25 = smov 48   ;;  %v3763_v44 = vmov 1983009808  }
  0xb3   : > { %3329 = vmatprep.subr.bf16.mxu1 %v3328_v5  ;;  %3203 = vmatprep.mubr.msk.f32.mxu1 %vm424_vm1, %v405_v10  ;;  %v409_v11 = vld [vmem:[#allocation7] sm:$0xff]  ;;  %v504_v17 = vld [vmem:[#allocation8 + $0x30] sm:$0xff]  ;;  %v505_v18 = vld [vmem:[#allocation8 + $0x38] sm:$0xff]  ;;  %v3320_v19 = vpack.c.bf16 %v412_v16, %v411_v14  ;;  %v623_v45 = vunpack.c.l.s4 %v3763_v44  ;;  %v3764_v47 = vmov 1934713408   ;;  %vm1932_vm2 = vcmask 130048  }
  0xb4   : > { %3331 = vmatpush3.bf16.msra.mxu1 %v3328_v5  ;;  %v3317_v13 = vpack.c.bf16 %v410_v12, %v409_v11  ;;  %v413_v20 = vld [vmem:[#allocation7 + $0x20] sm:$0xff]  ;;  %v414_v21 = vld [vmem:[#allocation7 + $0x28] sm:$0xff]  ;;  %v3340_v22 = vpack.c.bf16 %v505_v18, %v504_v17  ;;  %v415_v24 = vld [vmem:[#allocation7 + $0x30] sm:$0xff]  ;;  %v655_v48 = vunpack.c.l.s4 %v3764_v47  ;;  %vm2280_vm5 = vcmask 261120   ;;  %s3765_s17 = smov 32   ;;  %s3766_s18 = smov 16  }
  0xb5   : > { %3333 = vmatprep.subr.bf16.mxu1 %v3332_v7  ;;  %v3323_v23 = vpack.c.bf16 %v414_v21, %v413_v20  ;;  %v416_v25 = vld [vmem:[#allocation7 + $0x38] sm:$0xff]  ;;  %v406_v27 = vld [vmem:[%s4069_s10 + $0x8] sm:$0xff]  ;;  %v407_v28 = vld [vmem:[%s4069_s10 + $0x10] sm:$0xff]  ;;  %v624_v49 = vunpack.c.0.s8 %v623_v45  ;;  %vm2779_vm6 = vcmask 392192   ;;  %s3094_s27 = sshll.u32 %s3834_s9, 6  ;;  %vm2869_vm7 = vcmask 519168  }
  0xb6   : > { %3318 = vmatpush3.bf16.msra.mxu0 %v3317_v13  ;;  %v3326_v26 = vpack.c.bf16 %v416_v25, %v415_v24  ;;  %v404_v29 = vld [vmem:[%s4061_s16] sm:$0xff]  ;;  %v656_v53 = vunpack.c.0.s8 %v655_v48  ;;  %vm4227_vm3 = vmpackc.low %vm1932_vm2, %vm1932_vm2  ;;  %s3023_s16 = sshll.u32 %s4057_s24, 2  ;;  %s3767_s9 = smov [#allocation11]  }
  0xb7   : > { %3319 = vmatprep.subr.bf16.mxu0 %v3755_v0  ;;  %v408_v30 = vld [vmem:[%s4069_s10 + $0x18] sm:$0xff]  ;;  %v3026_v31 = vld [vmem:[%s4625_s5] ss:$0 sm:$0xff]  ;;  %v4143_v54 = vsub.s32 %v624_v49, %v626_v50  ;;  %s403_s10 = scalar_lea.vmem [#allocation11], %s3023_s16  ;;  %s3672_s21 = sshll.u32 %s3767_s9, 4  ;;  %s3673_s21 = int_to_ptr.vmem [resolvable:$false] %s3672_s21 }
  0xb8   : > { %3335 = vmatpush3.bf16.msra.mxu1 %v3332_v7  ;;  %v3024_v42 = vld [vmem:[%s4624_s4] ss:$0 sm:$0xff]  ;;  %v4147_v61 = vsub.s32 %v656_v53, %v626_v50  ;;  %s2885_s11 = sshll.u32 %s403_s10, 4  ;;  %s4578_s11 = int_to_ptr.vmem [resolvable:$true] %s2885_s11 }
  0xb9   : > { %3337 = vmatprep.subr.bf16.mxu1 %v3336_v15  ;;  %s3668_s20 = scalar_lea.vmem %s4578_s11, 64  ;;  %p3675_p8 = scmp.lt.s32.totalorder %s4578_s11, %s3673_s21 }
  0xba   : > { %3321 = vmatpush3.bf16.msra.mxu0 %v3320_v19  ;;  %p3669_p2 = scmp.ne.s32.totalorder %s4578_s11, %s3668_s20 }
  0xbb   : > { %3322 = vmatprep.subr.bf16.mxu0 %v3755_v0 }
  0xbc   : > { %3339 = vmatpush3.bf16.msra.mxu1 %v3336_v15  ;;  %p3670_p4 = pnand %p3669_p2, %p3967_p5 }
  0xbd   : > { %3341 = vmatprep.subr.bf16.mxu1 %v3340_v22 }
  0xbe   : > { %3324 = vmatpush3.bf16.msra.mxu0 %v3323_v23  ;;  %p3671_p0 = pneg %p3670_p4 }
  0xbf   : > { %3325 = vmatprep.subr.bf16.mxu0 %v3755_v0 }
  0xc0   : > { %3343 = vmatpush3.bf16.msra.mxu1 %v3340_v22 }
  0xc1   : > { %3352 = vmatprep.subr.bf16.mxu1 %v3755_v0 }
  0xc2   : > { %3327 = vmatpush3.bf16.msra.mxu0 %v3326_v26 }
  0xc3   : > { %3204 = vmatmul.mubr.msk.f32.vlgmr.msra.gmra.mrb[0].mxu1 %vm424_vm1, %v406_v27  ;;  %3344 = vmatprep.subr.bf16.mxu0 %v3755_v0 }
  0xc4   : > { %3206 = vmatprep.mubr.msk.f32.mxu1 %vm424_vm1, %v407_v28 }
  0xc5   : > { %3185 = vmatmul.mubr.msk.f32.vlgmr.msra.gmra.mrb[0].mxu0 %vm424_vm1, %v404_v29 }
  0xc6   : > { %3217 = vmatprep.mubr.msk.f32.mxu0 %vm3756_vm0, %v3757_v1 }
  0xc7   : > { %3207 = vmatmul.mubr.msk.f32.gmra.mrb[2].mxu1 %vm424_vm1, %v408_v30 }
  0xc8   : > { %3228 = vmatprep.mubr.msk.f32.mxu1 %vm3756_vm0, %v3757_v1 }
 0x196   : > { %v3205_v32 = vpop.f32.mrb[0].mxu1 }
 0x197   : > { %v4108_v33 = vadd.f32 %v3205_v32, %v3026_v31  ;;  %v591_v34 = vpop.f32.mrb[1].mxu1 }
 0x198   : > { %v494_v35 = vpop.f32.mrb[0].mxu0  ;;  %v4112_v38 = vadd.f32 %v3026_v31, %v591_v34 }
 0x199   : > { %774 = vrot.lane.b32.xlu1 %v4108_v33, %s3758_s12  ;;  %762 = vrot.lane.b32.xlu0 %v4108_v33, %s3759_s19  ;;  %v3186_v36 = vpop.f32.mrb[1].mxu0  ;;  %v4131_v43 = vadd.f32 %v3024_v42, %v494_v35 }
 0x19a   : > { %v3208_v37 = vpop.f32.mrb[2].mxu1 }
 0x19b   : > { %v601_v39 = vpop.f32.mrb[3].mxu1  ;;  %v4116_v40 = vadd.f32 %v3208_v37, %v3026_v31 }
 0x19c   : > { %v4118_v41 = vadd.f32 %v3026_v31, %v601_v39 }
 0x19d   : > { %786 = vrot.lane.b32.xlu1 %v4108_v33, %s3760_s15  ;;  %760 = vrot.lane.b32.xlu0 %v4112_v38, %s3759_s19 }
 0x1a1   : > { %772 = vrot.lane.b32.xlu1 %v4112_v38, %s3758_s12  ;;  %784 = vrot.lane.b32.xlu0 %v4112_v38, %s3760_s15 }
 0x1a5   : > { %766 = vrot.lane.b32.xlu1 %v4116_v40, %s3759_s19  ;;  %764 = vrot.lane.b32.xlu0 %v4118_v41, %s3759_s19 }
 0x1a9   : > { %778 = vrot.lane.b32.xlu1 %v4116_v40, %s3758_s12  ;;  %776 = vrot.lane.b32.xlu0 %v4118_v41, %s3758_s12 }
 0x1ad   : > { %790 = vrot.lane.b32.xlu1 %v4116_v40, %s3760_s15  ;;  %788 = vrot.lane.b32.xlu0 %v4118_v41, %s3760_s15 }
 0x1b1   : > { %614 = vrot.lane.b32.xlu1 %v4131_v43, %s3758_s12  ;;  %611 = vrot.lane.b32.xlu0 %v4131_v43, %s3759_s19  ;;  %s4576_s19 = scalar_lea.hbm %s4628_s8, %s3094_s27 }
 0x1b5   : > { %796 = vrot.lane.b32.xlu1 %v4112_v38, %s3761_s2  ;;  %617 = vrot.lane.b32.xlu0 %v4131_v43, %s3760_s15  ;;  %s2872_s15 = scalar_lea.sflag [#allocation4], %s4057_s24 }
 0x1b9   : > { %808 = vrot.lane.b32.xlu1 %v4112_v38, %s3762_s25  ;;  %798 = vrot.lane.b32.xlu0 %v4108_v33, %s3761_s2 }
 0x20b   : > { %v775_v51 = vpop.permute.xlu1 %774  ;;  %v763_v52 = vpop.permute.xlu0 %762 }
 0x20c   : > { %v980_v55 = vcombine.low %v4108_v33, %v775_v51  ;;  %v981_v56 = vcombine.high %v4108_v33, %v775_v51 }
 0x20e   : > { %v988_v62 = vrot.slane %v980_v55, %v4143_v54  ;;  %v995_v63 = vrot.slane %v981_v56, %v4143_v54 }
 0x20f   : > { %v787_v57 = vpop.permute.xlu1 %786  ;;  %v761_v58 = vpop.permute.xlu0 %760 }
 0x210   : > { %v996_v59 = vcombine.low %v763_v52, %v787_v57  ;;  %v997_v60 = vcombine.high %v763_v52, %v787_v57 }
 0x212   : > { %v1004_v2 = vrot.slane %v996_v59, %v4143_v54  ;;  %v1011_v3 = vrot.slane %v997_v60, %v4143_v54 }
 0x213   : > { %v773_v4 = vpop.permute.xlu1 %772  ;;  %v785_v5 = vpop.permute.xlu0 %784 }
 0x214   : > { %v1044_v6 = vcombine.low %v988_v62, %v1004_v2  ;;  %v1045_v7 = vcombine.high %v988_v62, %v1004_v2  ;;  %v1060_v8 = vcombine.low %v995_v63, %v1011_v3  ;;  %v1061_v9 = vcombine.high %v995_v63, %v1011_v3 }
 0x215   : > { %v844_v10 = vcombine.low %v4112_v38, %v773_v4  ;;  %v845_v11 = vcombine.high %v4112_v38, %v773_v4  ;;  %v860_v12 = vcombine.low %v761_v58, %v785_v5  ;;  %v861_v13 = vcombine.high %v761_v58, %v785_v5 }
 0x216   : > { %v1052_v14 = vrot.slane %v1044_v6, %v4147_v61  ;;  %v1059_v15 = vrot.slane %v1045_v7, %v4147_v61  ;;  %v1068_v16 = vrot.slane %v1060_v8, %v4147_v61  ;;  %v1075_v17 = vrot.slane %v1061_v9, %v4147_v61 }
 0x217   : > { %v852_v18 = vrot.slane %v844_v10, %v4143_v54  ;;  %v859_v19 = vrot.slane %v845_v11, %v4143_v54  ;;  %v868_v20 = vrot.slane %v860_v12, %v4143_v54  ;;  %v875_v21 = vrot.slane %v861_v13, %v4143_v54  ;;  %v767_v22 = vpop.permute.xlu1 %766  ;;  %v765_v23 = vpop.permute.xlu0 %764 }
 0x218   : > { %v3041_v24 = vcombine.low %v1052_v14, %v1059_v15  ;;  %v3043_v25 = vcombine.high %v1052_v14, %v1059_v15  ;;  %v3045_v26 = vcombine.low %v1068_v16, %v1075_v17  ;;  %v3047_v27 = vcombine.high %v1068_v16, %v1075_v17 }
 0x219   : > { %v908_v28 = vcombine.low %v852_v18, %v868_v20  ;;  %v909_v29 = vcombine.high %v852_v18, %v868_v20  ;;  %v924_v30 = vcombine.low %v859_v19, %v875_v21  ;;  %v925_v31 = vcombine.high %v859_v19, %v875_v21 }
 0x21a   : > { %v4164_v32 = vrot.slane %v3041_v24, %v4143_v54  ;;  %v4167_v34 = vrot.slane %v3043_v25, %v4143_v54  ;;  %v4170_v35 = vrot.slane %v3045_v26, %v4143_v54  ;;  %v4173_v36 = vrot.slane %v3047_v27, %v4143_v54 }
 0x21b   : > { %v916_v37 = vrot.slane %v908_v28, %v4147_v61  ;;  %v923_v39 = vrot.slane %v909_v29, %v4147_v61  ;;  %v932_v42 = vrot.slane %v924_v30, %v4147_v61  ;;  %v939_v44 = vrot.slane %v925_v31, %v4147_v61  ;;  %v779_v45 = vpop.permute.xlu1 %778  ;;  %v777_v47 = vpop.permute.xlu0 %776 }
 0x21c   : > { %v1588_v48 = vcombine.low %v4164_v32, %v4167_v34  ;;  %v1620_v49 = vcombine.low %v4170_v35, %v4173_v36  ;;  %v1252_v2 = vcombine.low %v4116_v40, %v779_v45  ;;  %v1253_v3 = vcombine.high %v4116_v40, %v779_v45 }
 0x21d   : > { %v3033_v50 = vcombine.low %v916_v37, %v923_v39  ;;  %v3035_v51 = vcombine.high %v916_v37, %v923_v39  ;;  %v3037_v52 = vcombine.low %v932_v42, %v939_v44  ;;  %v3039_v53 = vcombine.high %v932_v42, %v939_v44 }
 0x21e   : > { %v4196_v59 = vrot.slane %v1588_v48, %v4147_v61  ;;  %v4199_v60 = vrot.slane %v1620_v49, %v4147_v61  ;;  %v1116_v8 = vcombine.low %v4118_v41, %v777_v47  ;;  %v1117_v9 = vcombine.high %v4118_v41, %v777_v47 }
 0x21f   : > { %v4184_v55 = vrot.slane %v3033_v50, %v4143_v54  ;;  %v4187_v56 = vrot.slane %v3035_v51, %v4143_v54  ;;  %v4190_v57 = vrot.slane %v3037_v52, %v4143_v54  ;;  %v4193_v58 = vrot.slane %v3039_v53, %v4143_v54  ;;  %v791_v4 = vpop.permute.xlu1 %790  ;;  %v789_v5 = vpop.permute.xlu0 %788 }
 0x220   : > { %v1268_v10 = vcombine.low %v767_v22, %v791_v4  ;;  %v1269_v11 = vcombine.high %v767_v22, %v791_v4  ;;  %v1132_v12 = vcombine.low %v765_v23, %v789_v5  ;;  %v1133_v13 = vcombine.high %v765_v23, %v789_v5 }
 0x221   : > { %v1452_v62 = vcombine.low %v4184_v55, %v4187_v56  ;;  %v1484_v63 = vcombine.low %v4190_v57, %v4193_v58  ;;  %v1260_v14 = vrot.slane %v1252_v2, %v4143_v54  ;;  %v1267_v15 = vrot.slane %v1253_v3, %v4143_v54 }
 0x222   : > { %v1652_v17 = vcombine.low %v4196_v59, %v4199_v60  ;;  %v1276_v18 = vrot.slane %v1268_v10, %v4143_v54  ;;  %v1283_v19 = vrot.slane %v1269_v11, %v4143_v54  ;;  %v1140_v20 = vrot.slane %v1132_v12, %v4143_v54 }
 0x223   : > { %v4208_v6 = vrot.slane %v1452_v62, %v4147_v61  ;;  %v4211_v7 = vrot.slane %v1484_v63, %v4147_v61  ;;  %v1147_v21 = vrot.slane %v1133_v13, %v4143_v54  ;;  %v1124_v23 = vrot.slane %v1116_v8, %v4143_v54  ;;  %v612_v52 = vpop.permute.xlu0 %611  ;;  %v615_v13 = vpop.permute.xlu1 %614 }
 0x224   : > { %v1131_v24 = vrot.slane %v1117_v9, %v4143_v54  ;;  %v1316_v26 = vcombine.low %v1260_v14, %v1276_v18  ;;  %v1317_v27 = vcombine.high %v1260_v14, %v1276_v18  ;;  %v1332_v28 = vcombine.low %v1267_v15, %v1283_v19 }
 0x225   : > { %v1516_v16 = vcombine.low %v4208_v6, %v4211_v7  ;;  %v1333_v29 = vcombine.high %v1267_v15, %v1283_v19  ;;  %v1180_v30 = vcombine.low %v1124_v23, %v1140_v20  ;;  %v1181_v31 = vcombine.high %v1124_v23, %v1140_v20 }
 0x226   : > { %v1196_v37 = vcombine.low %v1131_v24, %v1147_v21  ;;  %v1197_v39 = vcombine.high %v1131_v24, %v1147_v21  ;;  %v1324_v42 = vrot.slane %v1316_v26, %v4147_v61  ;;  %v1331_v44 = vrot.slane %v1317_v27, %v4147_v61 }
 0x227   : > { %v3345_v25 = vpack.c.bf16 %v1652_v17, %v1516_v16  ;;  %v1340_v45 = vrot.slane %v1332_v28, %v4147_v61  ;;  %v1347_v47 = vrot.slane %v1333_v29, %v4147_v61  ;;  %v1188_v48 = vrot.slane %v1180_v30, %v4147_v61  ;;  %v618_v24 = vpop.permute.xlu0 %617 }
 0x228   : > { %v1195_v49 = vrot.slane %v1181_v31, %v4147_v61  ;;  %v1204_v50 = vrot.slane %v1196_v37, %v4147_v61  ;;  %v1211_v51 = vrot.slane %v1197_v39, %v4147_v61  ;;  %v3057_v53 = vcombine.low %v1324_v42, %v1331_v44 }
 0x229   : > { %3347 = vmatpush3.bf16.xpose.msk.msra.mxu0 %vm4227_vm3, %v3345_v25  ;;  %v3059_v62 = vcombine.high %v1324_v42, %v1331_v44  ;;  %v3061_v63 = vcombine.low %v1340_v45, %v1347_v47  ;;  %v3063_v2 = vcombine.high %v1340_v45, %v1347_v47  ;;  %v620_v23 = vcombine.low %v4131_v43, %v615_v13 }
 0x22a   : > { %3348 = vmatprep.subr.bf16.mxu0 %v3755_v0  ;;  %v3049_v3 = vcombine.low %v1188_v48, %v1195_v49  ;;  %v3051_v4 = vcombine.high %v1188_v48, %v1195_v49  ;;  %v3053_v5 = vcombine.low %v1204_v50, %v1211_v51  ;;  %v3055_v8 = vcombine.high %v1204_v50, %v1211_v51 }
 0x22b   : > { %v4245_v9 = vrot.slane %v3057_v53, %v4143_v54  ;;  %v4248_v10 = vrot.slane %v3059_v62, %v4143_v54  ;;  %v4251_v11 = vrot.slane %v3061_v63, %v4143_v54  ;;  %v4254_v12 = vrot.slane %v3063_v2, %v4143_v54 }
 0x22c   : > { %v4257_v14 = vrot.slane %v3049_v3, %v4143_v54  ;;  %v4260_v15 = vrot.slane %v3051_v4, %v4143_v54  ;;  %v4263_v16 = vrot.slane %v3053_v5, %v4143_v54  ;;  %v4266_v17 = vrot.slane %v3055_v8, %v4143_v54 }
 0x22d   : > { %v1860_v18 = vcombine.low %v4245_v9, %v4248_v10  ;;  %v1892_v19 = vcombine.low %v4251_v11, %v4254_v12  ;;  %v621_v27 = vcombine.high %v4131_v43, %v615_v13  ;;  %v1517_v28 = vcombine.high %v4208_v6, %v4211_v7 }
 0x22e   : > { %v1724_v20 = vcombine.low %v4257_v14, %v4260_v15  ;;  %v1756_v21 = vcombine.low %v4263_v16, %v4266_v17  ;;  %v636_v31 = vcombine.low %v612_v52, %v618_v24  ;;  %v637_v37 = vcombine.high %v612_v52, %v618_v24 }
 0x22f   : > { %v1868_v25 = vrot.slane %v1860_v18, %v4147_v61  ;;  %v1900_v26 = vrot.slane %v1892_v19, %v4147_v61  ;;  %v1653_v39 = vcombine.high %v4196_v59, %v4199_v60  ;;  %v628_v44 = vrot.slane %v620_v23, %v4143_v54 }
 0x230   : > { %v1732_v29 = vrot.slane %v1724_v20, %v4147_v61  ;;  %v1764_v30 = vrot.slane %v1756_v21, %v4147_v61  ;;  %v635_v47 = vrot.slane %v621_v27, %v4143_v54  ;;  %v644_v43 = vrot.slane %v636_v31, %v4143_v54 }
 0x231   : > { %v1924_v42 = vcombine.low %v1868_v25, %v1900_v26  ;;  %v651_v48 = vrot.slane %v637_v37, %v4143_v54  ;;  %v3353_v6 = vpack.c.bf16 %v1653_v39, %v1517_v28  ;;  %v1925_v50 = vcombine.high %v1868_v25, %v1900_v26 }
 0x232   : > { %v1788_v45 = vcombine.low %v1732_v29, %v1764_v30  ;;  %v1789_v49 = vcombine.high %v1732_v29, %v1764_v30  ;;  %v652_v51 = vcombine.low %v628_v44, %v644_v43  ;;  %v653_v53 = vcombine.high %v628_v44, %v644_v43 }
 0x233   : > { %v668_v52 = vcombine.low %v635_v47, %v651_v48  ;;  %v669_v62 = vcombine.high %v635_v47, %v651_v48  ;;  %3355 = vmatpush3.bf16.xpose.msk.msra.mxu1 %vm4227_vm3, %v3353_v6  ;;  %v1453_v59 = vcombine.high %v4184_v55, %v4187_v56  ;;  %v1485_v60 = vcombine.high %v4190_v57, %v4193_v58 }
 0x234   : > { %v3349_v7 = vpack.c.bf16 %v1924_v42, %v1788_v45  ;;  %3356 = vmatprep.subr.bf16.mxu1 %v3755_v0  ;;  %v660_v63 = vrot.slane %v652_v51, %v4147_v61  ;;  %v667_v2 = vrot.slane %v653_v53, %v4147_v61  ;;  %v1589_v55 = vcombine.high %v4164_v32, %v4167_v34 }
 0x235   : > { %v676_v3 = vrot.slane %v668_v52, %v4147_v61  ;;  %v683_v4 = vrot.slane %v669_v62, %v4147_v61  ;;  %v1621_v56 = vcombine.high %v4170_v35, %v4173_v36  ;;  %v3357_v57 = vpack.c.bf16 %v1925_v50, %v1789_v49 }
 0x236   : > { %3351 = vmatpush3.bf16.xpose.msk.msra.mxu0 %vm4227_vm3, %v3349_v7  ;;  %v688_v58 = vcombine.low %v660_v63, %v667_v2  ;;  %v3031_v5 = vcombine.high %v660_v63, %v667_v2  ;;  %v1467_v18 = vrot.slane %v1453_v59, %v4147_v61  ;;  %v1499_v19 = vrot.slane %v1485_v60, %v4147_v61 }
 0x237   : > { %3360 = vmatprep.subr.bf16.mxu0 %v3755_v0  ;;  %v704_v8 = vcombine.low %v676_v3, %v683_v4  ;;  %v3032_v13 = vcombine.high %v676_v3, %v683_v4  ;;  %v1603_v34 = vrot.slane %v1589_v55, %v4147_v61  ;;  %v1635_v35 = vrot.slane %v1621_v56, %v4147_v61 }
 0x238   : > { %v695_v20 = vrot.slane %v688_v58, %v4143_v54  ;;  %v703_v21 = vrot.slane %v3031_v5, %v4143_v54  ;;  %v1861_v36 = vcombine.high %v4245_v9, %v4248_v10  ;;  %v1893_v26 = vcombine.high %v4251_v11, %v4254_v12 }
 0x239   : > { %v711_v23 = vrot.slane %v704_v8, %v4143_v54  ;;  %v719_v32 = vrot.slane %v3032_v13, %v4143_v54  ;;  %v1725_v27 = vcombine.high %v4257_v14, %v4260_v15  ;;  %v1757_v28 = vcombine.high %v4263_v16, %v4266_v17 }
 0x23a   : > { %v720_v24 = vcombine.low %v695_v20, %v703_v21  ;;  %v1518_v29 = vcombine.low %v1467_v18, %v1499_v19  ;;  %v1519_v10 = vcombine.high %v1467_v18, %v1499_v19  ;;  %v1654_v31 = vcombine.low %v1603_v34, %v1635_v35 }
 0x23b   : > { %v736_v25 = vcombine.low %v711_v23, %v719_v32  ;;  %3359 = vmatpush3.bf16.xpose.msk.msra.mxu1 %vm4227_vm3, %v3357_v57  ;;  %v1875_v37 = vrot.slane %v1861_v36, %v4147_v61  ;;  %v1655_v11 = vcombine.high %v1603_v34, %v1635_v35  ;;  %v1907_v12 = vrot.slane %v1893_v26, %v4147_v61 }
 0x23c   : > { %3368 = vmatprep.subr.bf16.mxu1 %v3755_v0  ;;  %v728_v30 = vrot.slane %v720_v24, %v4147_v61  ;;  %v1739_v14 = vrot.slane %v1725_v27, %v4147_v61  ;;  %v1771_v15 = vrot.slane %v1757_v28, %v4147_v61  ;;  %v3361_v16 = vpack.c.bf16 %v1654_v31, %v1518_v29 }
 0x23d   : > { %v744_v9 = vrot.slane %v736_v25, %v4147_v61  ;;  %v3369_v17 = vpack.c.bf16 %v1655_v11, %v1519_v10  ;;  %v1926_v45 = vcombine.low %v1875_v37, %v1907_v12  ;;  %v1927_v43 = vcombine.high %v1875_v37, %v1907_v12 }
 0x23e   : > { %v1790_v44 = vcombine.low %v1739_v14, %v1771_v15  ;;  %v1791_v47 = vcombine.high %v1739_v14, %v1771_v15  ;;  %v721_v48 = vcombine.high %v695_v20, %v703_v21  ;;  %v737_v6 = vcombine.high %v711_v23, %v719_v32 }
 0x23f   : > { %v752_v39 = vcombine.low %v728_v30, %v744_v9  ;;  %v753_v42 = vcombine.high %v728_v30, %v744_v9  ;;  %v2274_v22 = vand.u32 127, %v625_v46 }
 0x240   : > { %v3365_v7 = vpack.c.bf16 %v1926_v45, %v1790_v44  ;;  %v3373_v49 = vpack.c.bf16 %v1927_v43, %v1791_v47  ;;  %v735_v50 = vrot.slane %v721_v48, %v4147_v61  ;;  %v751_v51 = vrot.slane %v737_v6, %v4147_v61 }
 0x241   : > { %3218 = vmatmul.mubr.msk.f32.vlgmr.msra.gmra.mrb[2].mxu0 %vm1932_vm2, %v752_v39  ;;  %vm2275_vm4 = vcmp.lt.s32.totalorder %v2274_v22, 28 }
 0x242   : > { %3229 = vmatmul.mubr.msk.f32.vlgmr.msra.gmra.mrb[4].mxu1 %vm1932_vm2, %v753_v42  ;;  %3363 = vmatpush3.bf16.xpose.msk.msra.mxu0 %vm4227_vm3, %v3361_v16  ;;  %v754_v53 = vcombine.low %v735_v50, %v751_v51  ;;  %v755_v52 = vcombine.high %v735_v50, %v751_v51 }
 0x243   : > { %3371 = vmatpush3.bf16.xpose.msk.msra.mxu1 %vm4227_vm3, %v3369_v17  ;;  %3364 = vmatprep.subr.bf16.mxu0 %v3755_v0 }
 0x244   : > { %3372 = vmatprep.subr.bf16.mxu1 %v3755_v0  ;;  %3239 = vmatprep.mubr.msk.f32.mxu0 %vm3756_vm0, %v3757_v1 }
 0x245   : > { %3250 = vmatprep.mubr.msk.f32.mxu1 %vm3756_vm0, %v3757_v1 }
 0x24a   : > { %3367 = vmatpush3.bf16.xpose.msk.msra.mxu0 %vm4227_vm3, %v3365_v7 }
 0x24b   : > { %3375 = vmatpush3.bf16.xpose.msk.msra.mxu1 %vm4227_vm3, %v3373_v49  ;;  %3388 = vmatprep.subr.bf16.mxu0 %v3755_v0 }
 0x24c   : > { %3376 = vmatprep.subr.bf16.mxu1 %v3755_v0 }
 0x251   : > { %3240 = vmatmul.mubr.msk.f32.vlgmr.msra.gmra.mrb[4].mxu0 %vm1932_vm2, %v754_v53 }
 0x252   : > { %3251 = vmatmul.mubr.msk.f32.vlgmr.msra.gmra.mrb[6].mxu1 %vm1932_vm2, %v755_v52  ;;  %3283 = vmatprep.mubr.msk.f32.mxu0 %vm3756_vm0, %v3757_v1 }
 0x253   : > { %3261 = vmatprep.mubr.msk.f32.mxu1 %vm3756_vm0, %v3757_v1 }
 0x314   : > { %v2014_v62 = vpop.f32.mrb[2].mxu0 }
 0x315   : > { %v2276_v59 = vsel %vm2275_vm4, %v2014_v62, -1e+30  ;;  %v2099_v60 = vpop.f32.mrb[4].mxu1  ;;  %v3219_v63 = vpop.f32.mrb[3].mxu0 }
 0x316   : > { %v2277_v2 = vsel %vm2275_vm4, %v2099_v60, -1e+30  ;;  %v3230_v3 = vpop.f32.mrb[5].mxu1  ;;  %v2281_v4 = vsel %vm2280_vm5, %v2276_v59, -inf }
 0x317   : > { %v2284_v55 = vsel %vm2280_vm5, %v2277_v2, -inf  ;;  %2282 = vmax.xlane.f32.xlu1 %v2281_v4 }
 0x318   : > { %2285 = vmax.xlane.f32.xlu0 %v2284_v55 }
 0x324   : > { %v2184_v56 = vpop.f32.mrb[4].mxu0 }
 0x325   : > { %v2278_v57 = vsel %vm2275_vm4, %v2184_v56, -1e+30  ;;  %v2269_v46 = vpop.f32.mrb[6].mxu1  ;;  %v3241_v58 = vpop.f32.mrb[5].mxu0 }
 0x326   : > { %v3252_v5 = vpop.f32.mrb[7].mxu1  ;;  %v2287_v8 = vsel %vm2280_vm5, %v2278_v57, -inf  ;;  %v2279_v13 = vsel %vm2275_vm4, %v2269_v46, -1e+30 }
 0x327   : > { %2288 = vmax.xlane.f32.xlu0 %v2287_v8  ;;  %v2290_v18 = vsel %vm2280_vm5, %v2279_v13, -inf }
 0x328   : > { %810 = vrot.lane.b32.xlu1 %v4108_v33, %s3762_s25 }
 0x33d   : > { %820 = vrot.lane.b32.xlu0 %v4112_v38, %s3765_s17 }
 0x34c   : > { %2291 = vmax.xlane.f32.xlu1 %v2290_v18 }
 0x35d   : > { %822 = vrot.lane.b32.xlu1 %v4108_v33, %s3765_s17 }
 0x361   : > { %834 = vrot.lane.b32.xlu1 %v4108_v33, %s3766_s18  ;;  %v4392_v33 = vpop.permute.xlu1 %796 }
 0x365   : > { %800 = vrot.lane.b32.xlu1 %v4118_v41, %s3761_s2  ;;  %v4394_v19 = vpop.permute.xlu1 %808 }
 0x369   : > { %802 = vrot.lane.b32.xlu1 %v4116_v40, %s3761_s2  ;;  %s3674_s2 = scalar_lea.vmem %s3673_s21, 128 }
 0x36a   : > { %p3676_p6 = scmp.lt.s32.totalorder %s3674_s2, %s3668_s20 }
 0x36c   : > { %p3677_p10 = por %p3676_p6, %p3675_p8 }
 0x36d   : > { %812 = vrot.lane.b32.xlu1 %v4118_v41, %s3762_s25 }
 0x36e   : > { %p3678_p3 = pnand %p3677_p10, %p3671_p0 }
 0x371   : > { %814 = vrot.lane.b32.xlu1 %v4116_v40, %s3762_s25 }
 0x375   : > { %824 = vrot.lane.b32.xlu1 %v4118_v41, %s3765_s17 }
 0x379   : > { %826 = vrot.lane.b32.xlu1 %v4116_v40, %s3765_s17 }
 0x37d   : > { %836 = vrot.lane.b32.xlu1 %v4118_v41, %s3766_s18  ;;  %v799_v41 = vpop.permute.xlu0 %798 }
 0x381   : > { %838 = vrot.lane.b32.xlu1 %v4116_v40, %s3766_s18 }
 0x3a4   : > { %v2283_v20 = vpop.xlane.xlu1 %2282 }
 0x3a5   : > { %v2293_v21 = vsub.f32 %v2276_v59, %v2283_v20  ;;  %v2286_v35 = vpop.xlane.xlu0 %2285 }
 0x3a6   : > { %v2294_v40 = vsub.f32 %v2277_v2, %v2286_v35 }
 0x3a7   : > { %v2297_v23 = vmul.f32 1.442695, %v2293_v21 }
 0x3a8   : > { %v811_v36 = vpop.permute.xlu1 %810  ;;  %v2299_v25 = vmul.f32 1.442695, %v2294_v40 }
 0x3a9   : > { %3508 = vpow2.f32 %v2297_v23 }
 0x3aa   : > { %3510 = vpow2.f32 %v2299_v25 }
 0x3b3   : > { %v4396_v32 = vpop.eup %3508 }
 0x3b4   : > { %v2305_v34 = vsel %vm2280_vm5, %v4396_v32, 0.0  ;;  %v2289_v24 = vpop.xlane.xlu0 %2288  ;;  %v4406_v15 = vpop.eup %3510 }
 0x3b5   : > { %2306 = vadd.xlane.f32.xlu0 %v2305_v34  ;;  %v2295_v26 = vsub.f32 %v2278_v57, %v2289_v24  ;;  %v2308_v50 = vsel %vm2280_vm5, %v4406_v15, 0.0 }
 0x3b7   : > { %v2301_v29 = vmul.f32 1.442695, %v2295_v26 }
 0x3cb   : > { %832 = vrot.lane.b32.xlu0 %v4112_v38, %s3766_s18 }
 0x3d9   : > { %v2292_v27 = vpop.xlane.xlu1 %2291 }
 0x3da   : > { %v2296_v28 = vsub.f32 %v2279_v13, %v2292_v27 }
 0x3dc   : > { %v2303_v30 = vmul.f32 1.442695, %v2296_v28 }
 0x3dd   : > { %v823_v9 = vpop.permute.xlu1 %822 }
 0x3de   : > { %3512 = vpow2.f32 %v2303_v30  ;;  %v1012_v10 = vcombine.low %v799_v41, %v823_v9  ;;  %v1013_v31 = vcombine.high %v799_v41, %v823_v9 }
 0x3df   : > { %3514 = vpow2.f32 %v2301_v29 }
 0x3e0   : > { %v1020_v42 = vrot.slane %v1012_v10, %v4143_v54  ;;  %v1027_v11 = vrot.slane %v1013_v31, %v4143_v54 }
 0x3e1   : > { %v835_v37 = vpop.permute.xlu1 %834 }
 0x3e2   : > { %v1028_v39 = vcombine.low %v811_v36, %v835_v37  ;;  %v1029_v38 = vcombine.high %v811_v36, %v835_v37 }
 0x3e4   : > { %v1036_v12 = vrot.slane %v1028_v39, %v4143_v54  ;;  %v1043_v14 = vrot.slane %v1029_v38, %v4143_v54 }
 0x3e5   : > { %v801_v23 = vpop.permute.xlu1 %800 }
 0x3e6   : > { %v1076_v16 = vcombine.low %v1020_v42, %v1036_v12  ;;  %v1077_v17 = vcombine.high %v1020_v42, %v1036_v12  ;;  %v1092_v44 = vcombine.low %v1027_v11, %v1043_v14  ;;  %v1093_v45 = vcombine.high %v1027_v11, %v1043_v14  ;;  %v821_v12 = vpop.permute.xlu0 %820 }
 0x3e8   : > { %v4408_v47 = vpop.eup %3512  ;;  %v1084_v43 = vrot.slane %v1076_v16, %v4147_v61  ;;  %v1091_v48 = vrot.slane %v1077_v17, %v4147_v61  ;;  %v1100_v6 = vrot.slane %v1092_v44, %v4147_v61  ;;  %v1107_v7 = vrot.slane %v1093_v45, %v4147_v61 }
 0x3e9   : > { %v2314_v49 = vsel %vm2280_vm5, %v4408_v47, 0.0  ;;  %v4418_v51 = vpop.eup %3514  ;;  %v803_v34 = vpop.permute.xlu1 %802 }
 0x3ea   : > { %v3042_v53 = vcombine.low %v1084_v43, %v1091_v48  ;;  %v3044_v52 = vcombine.high %v1084_v43, %v1091_v48  ;;  %v3046_v22 = vcombine.low %v1100_v6, %v1107_v7  ;;  %v3048_v62 = vcombine.high %v1100_v6, %v1107_v7  ;;  %2315 = vadd.xlane.f32.xlu1 %v2314_v49 }
 0x3eb   : > { %2309 = vadd.xlane.f32.xlu0 %v2308_v50  ;;  %v2311_v3 = vsel %vm2280_vm5, %v4418_v51, 0.0 }
 0x3ec   : > { %v1539_v59 = vrot.slane %v3042_v53, %v4143_v54  ;;  %v1555_v60 = vrot.slane %v3044_v52, %v4143_v54  ;;  %v1571_v63 = vrot.slane %v3046_v22, %v4143_v54  ;;  %v1587_v2 = vrot.slane %v3048_v62, %v4143_v54 }
 0x3ed   : > { %v813_v41 = vpop.permute.xlu1 %812 }
 0x3ee   : > { %v1604_v4 = vcombine.low %v1539_v59, %v1555_v60  ;;  %v1636_v55 = vcombine.low %v1571_v63, %v1587_v2  ;;  %v1605_v56 = vcombine.high %v1539_v59, %v1555_v60  ;;  %v1637_v57 = vcombine.high %v1571_v63, %v1587_v2 }
 0x3ef   : > { %2312 = vadd.xlane.f32.xlu0 %v2311_v3  ;;  %v876_v2 = vcombine.low %v4392_v33, %v821_v12  ;;  %v877_v3 = vcombine.high %v4392_v33, %v821_v12 }
 0x3f0   : > { %v4427_v46 = vrot.slane %v1604_v4, %v4147_v61  ;;  %v4430_v58 = vrot.slane %v1636_v55, %v4147_v61  ;;  %v4433_v5 = vrot.slane %v1605_v56, %v4147_v61  ;;  %v4436_v8 = vrot.slane %v1637_v57, %v4147_v61 }
 0x3f1   : > { %v815_v35 = vpop.permute.xlu1 %814  ;;  %v891_v33 = vrot.slane %v877_v3, %v4143_v54 }
 0x3f2   : > { %v1656_v13 = vcombine.low %v4427_v46, %v4430_v58  ;;  %v1658_v18 = vcombine.low %v4433_v5, %v4436_v8  ;;  %v1657_v20 = vcombine.high %v4427_v46, %v4430_v58  ;;  %v1659_v21 = vcombine.high %v4433_v5, %v4436_v8  ;;  %v2781_v8 = vld [vmem:[#allocation10] sm:$0xff] }
 0x3f5   : > { %v825_v40 = vpop.permute.xlu1 %824 }
 0x3f6   : > { %v1148_v30 = vcombine.low %v801_v23, %v825_v40  ;;  %v1149_v37 = vcombine.high %v801_v23, %v825_v40 }
 0x3f8   : > { %v1156_v11 = vrot.slane %v1148_v30, %v4143_v54  ;;  %v1163_v45 = vrot.slane %v1149_v37, %v4143_v54 }
 0x3f9   : > { %v827_v36 = vpop.permute.xlu1 %826 }
 0x3fa   : > { %v1284_v27 = vcombine.low %v803_v34, %v827_v36  ;;  %v1285_v9 = vcombine.high %v803_v34, %v827_v36 }
 0x3fc   : > { %v1292_v39 = vrot.slane %v1284_v27, %v4143_v54  ;;  %v1299_v14 = vrot.slane %v1285_v9, %v4143_v54 }
 0x3fd   : > { %v837_v24 = vpop.permute.xlu1 %836 }
 0x3fe   : > { %v1164_v28 = vcombine.low %v813_v41, %v837_v24  ;;  %v1165_v10 = vcombine.high %v813_v41, %v837_v24 }
 0x400   : > { %v1172_v38 = vrot.slane %v1164_v28, %v4143_v54  ;;  %v1179_v16 = vrot.slane %v1165_v10, %v4143_v54 }
 0x401   : > { %v839_v25 = vpop.permute.xlu1 %838 }
 0x402   : > { %v1300_v26 = vcombine.low %v815_v35, %v839_v25  ;;  %v1301_v29 = vcombine.high %v815_v35, %v839_v25  ;;  %v1212_v43 = vcombine.low %v1156_v11, %v1172_v38  ;;  %v1213_v48 = vcombine.high %v1156_v11, %v1172_v38 }
 0x403   : > { %v1228_v49 = vcombine.low %v1163_v45, %v1179_v16  ;;  %v1229_v50 = vcombine.high %v1163_v45, %v1179_v16  ;;  %v884_v25 = vrot.slane %v876_v2, %v4143_v54 }
 0x404   : > { %v1308_v31 = vrot.slane %v1300_v26, %v4143_v54  ;;  %v1315_v42 = vrot.slane %v1301_v29, %v4143_v54  ;;  %v1220_v62 = vrot.slane %v1212_v43, %v4147_v61  ;;  %v1227_v59 = vrot.slane %v1213_v48, %v4147_v61 }
 0x405   : > { %v1236_v4 = vrot.slane %v1228_v49, %v4147_v61  ;;  %v1243_v55 = vrot.slane %v1229_v50, %v4147_v61 }
 0x406   : > { %v1348_v17 = vcombine.low %v1292_v39, %v1308_v31  ;;  %v1349_v44 = vcombine.high %v1292_v39, %v1308_v31  ;;  %v1364_v6 = vcombine.low %v1299_v14, %v1315_v42  ;;  %v1365_v7 = vcombine.high %v1299_v14, %v1315_v42 }
 0x407   : > { %v3050_v35 = vcombine.low %v1220_v62, %v1227_v59  ;;  %v3052_v40 = vcombine.high %v1220_v62, %v1227_v59  ;;  %v3054_v28 = vcombine.low %v1236_v4, %v1243_v55  ;;  %v3056_v29 = vcombine.high %v1236_v4, %v1243_v55 }
 0x408   : > { %v1356_v53 = vrot.slane %v1348_v17, %v4147_v61  ;;  %v1363_v52 = vrot.slane %v1349_v44, %v4147_v61  ;;  %v1372_v60 = vrot.slane %v1364_v6, %v4147_v61  ;;  %v1379_v63 = vrot.slane %v1365_v7, %v4147_v61 }
 0x409   : > { %v1675_v39 = vrot.slane %v3050_v35, %v4143_v54  ;;  %v1691_v38 = vrot.slane %v3052_v40, %v4143_v54  ;;  %v1707_v44 = vrot.slane %v3054_v28, %v4143_v54  ;;  %v1723_v45 = vrot.slane %v3056_v29, %v4143_v54 }
 0x40a   : > { %v3058_v56 = vcombine.low %v1356_v53, %v1363_v52  ;;  %v3060_v57 = vcombine.high %v1356_v53, %v1363_v52  ;;  %v3062_v36 = vcombine.low %v1372_v60, %v1379_v63  ;;  %v3064_v24 = vcombine.high %v1372_v60, %v1379_v63 }
 0x40b   : > { %v1740_v50 = vcombine.low %v1675_v39, %v1691_v38  ;;  %v1772_v4 = vcombine.low %v1707_v44, %v1723_v45 }
 0x40c   : > { %v1811_v30 = vrot.slane %v3058_v56, %v4143_v54  ;;  %v1827_v9 = vrot.slane %v3060_v57, %v4143_v54  ;;  %v1843_v42 = vrot.slane %v3062_v36, %v4143_v54  ;;  %v1859_v11 = vrot.slane %v3064_v24, %v4143_v54 }
 0x40d   : > { %v1741_v56 = vcombine.high %v1675_v39, %v1691_v38  ;;  %v1773_v57 = vcombine.high %v1707_v44, %v1723_v45  ;;  %v1748_v29 = vrot.slane %v1740_v50, %v4147_v61 }
 0x40e   : > { %v1876_v43 = vcombine.low %v1811_v30, %v1827_v9  ;;  %v1908_v53 = vcombine.low %v1843_v42, %v1859_v11  ;;  %v1877_v52 = vcombine.high %v1811_v30, %v1827_v9  ;;  %v1909_v62 = vcombine.high %v1843_v42, %v1859_v11 }
 0x410   : > { %v1884_v55 = vrot.slane %v1876_v43, %v4147_v61  ;;  %v1916_v36 = vrot.slane %v1908_v53, %v4147_v61  ;;  %v4493_v24 = vrot.slane %v1877_v52, %v4147_v61 }
 0x412   : > { %v1928_v38 = vcombine.low %v1884_v55, %v1916_v36  ;;  %v1929_v45 = vcombine.high %v1884_v55, %v1916_v36 }
 0x442   : > { %v4456_v22 = vpop.xlane.xlu0 %2306 }
 0x443   : > { %3516 = vrcp.f32 %v4456_v22 }
 0x446   : > { %v833_v23 = vpop.permute.xlu0 %832 }
 0x447   : > { %v892_v34 = vcombine.low %v4394_v19, %v833_v23  ;;  %v893_v41 = vcombine.high %v4394_v19, %v833_v23 }
 0x449   : > { %v900_v26 = vrot.slane %v892_v34, %v4143_v54  ;;  %v907_v27 = vrot.slane %v893_v41, %v4143_v54 }
 0x44b   : > { %v940_v10 = vcombine.low %v884_v25, %v900_v26  ;;  %v941_v19 = vcombine.high %v884_v25, %v900_v26  ;;  %v956_v31 = vcombine.low %v891_v33, %v907_v27  ;;  %v957_v37 = vcombine.high %v891_v33, %v907_v27 }
 0x44c   : > { %v4496_v25 = vrot.slane %v1909_v62, %v4147_v61 }
 0x44d   : > { %v948_v12 = vrot.slane %v940_v10, %v4147_v61  ;;  %v955_v14 = vrot.slane %v941_v19, %v4147_v61  ;;  %v964_v16 = vrot.slane %v956_v31, %v4147_v61  ;;  %v971_v17 = vrot.slane %v957_v37, %v4147_v61  ;;  %v3517_v59 = vpop.eup %3516 }
 0x44e   : > { %v2321_v40 = vmul.f32 %v3517_v59, %v4456_v22  ;;  %v1780_v22 = vrot.slane %v1772_v4, %v4147_v61  ;;  %v1755_v10 = vrot.slane %v1741_v56, %v4147_v61  ;;  %v1787_v19 = vrot.slane %v1773_v57, %v4147_v61 }
 0x44f   : > { %v3034_v48 = vcombine.low %v948_v12, %v955_v14  ;;  %v3036_v6 = vcombine.high %v948_v12, %v955_v14  ;;  %v3038_v7 = vcombine.low %v964_v16, %v971_v17  ;;  %v3040_v49 = vcombine.high %v964_v16, %v971_v17 }
 0x450   : > { %v2325_v31 = vsub.f32 2.0, %v2321_v40  ;;  %v1930_v42 = vcombine.low %v4493_v24, %v4496_v25  ;;  %v1792_v11 = vcombine.low %v1748_v29, %v1780_v22  ;;  %v1794_v12 = vcombine.low %v1755_v10, %v1787_v19 }
 0x451   : > { %v1403_v60 = vrot.slane %v3034_v48, %v4143_v54  ;;  %v1419_v63 = vrot.slane %v3036_v6, %v4143_v54  ;;  %v1435_v2 = vrot.slane %v3038_v7, %v4143_v54  ;;  %v1451_v3 = vrot.slane %v3040_v49, %v4143_v54 }
 0x452   : > { %v2329_v14 = vmul.f32 %v3517_v59, %v2325_v31  ;;  %v3380_v16 = vpack.c.bf16 %v1928_v38, %v1792_v11  ;;  %v3392_v17 = vpack.c.bf16 %v1930_v42, %v1794_v12  ;;  %v1793_v43 = vcombine.high %v1748_v29, %v1780_v22  ;;  %v2785_v42 = vld [vmem:[#allocation10 + $0x20] sm:$0xff]  ;;  %v2786_v11 = vld [vmem:[#allocation10 + $0x28] sm:$0xff] }
 0x453   : > { %v1468_v23 = vcombine.low %v1403_v60, %v1419_v63  ;;  %v1500_v34 = vcombine.low %v1435_v2, %v1451_v3  ;;  %v1469_v41 = vcombine.high %v1403_v60, %v1419_v63  ;;  %v1501_v35 = vcombine.high %v1435_v2, %v1451_v3 }
 0x454   : > { %v3386_v48 = vpack.c.bf16 %v1929_v45, %v1793_v43  ;;  %v1931_v4 = vcombine.high %v4493_v24, %v4496_v25  ;;  %v1795_v56 = vcombine.high %v1755_v10, %v1787_v19 }
 0x455   : > { %v1476_v33 = vrot.slane %v1468_v23, %v4147_v61  ;;  %v1508_v26 = vrot.slane %v1500_v34, %v4147_v61  ;;  %v1483_v27 = vrot.slane %v1469_v41, %v4147_v61  ;;  %v1515_v28 = vrot.slane %v1501_v35, %v4147_v61  ;;  %v2783_v34 = vld [vmem:[#allocation10 + $0x10] sm:$0xff]  ;;  %v2784_v35 = vld [vmem:[#allocation10 + $0x18] sm:$0xff] }
 0x457   : > { %v1520_v30 = vcombine.low %v1476_v33, %v1508_v26  ;;  %v1522_v9 = vcombine.low %v1483_v27, %v1515_v28  ;;  %v1523_v52 = vcombine.high %v1483_v27, %v1515_v28 }
 0x459   : > { %v3377_v37 = vpack.c.bf16 %v1656_v13, %v1520_v30  ;;  %v3389_v39 = vpack.c.bf16 %v1658_v18, %v1522_v9  ;;  %v1521_v13 = vcombine.high %v1476_v33, %v1508_v26  ;;  %v2333_v18 = vmul.f32 %v4396_v32, %v2329_v14 }
 0x45a   : > { %v3395_v3 = vpack.c.bf16 %v1659_v21, %v1523_v52  ;;  %v2782_v21 = vld [vmem:[#allocation10 + $0x8] sm:$0xff] }
 0x45b   : > { %3378 = vmatpush3.bf16.msra.mxu1 %v3377_v37  ;;  %3390 = vmatpush3.bf16.msra.mxu0 %v3389_v39  ;;  %v3383_v44 = vpack.c.bf16 %v1657_v20, %v1521_v13  ;;  %v3401_v41 = vpack.c.bf16 %v2782_v21, %v2781_v8  ;;  %v3407_v13 = vpack.c.bf16 %v2786_v11, %v2785_v42 }
 0x45c   : > { %3379 = vmatprep.subr.bf16.mxu1 %v3755_v0  ;;  %3391 = vmatprep.subr.bf16.mxu0 %v3755_v0 }
 0x45f   : > { %3381 = vmatpush3.bf16.msra.mxu1 %v3380_v16  ;;  %3393 = vmatpush3.bf16.msra.mxu0 %v3392_v17 }
 0x460   : > { %3382 = vmatprep.subr.bf16.mxu1 %v3755_v0  ;;  %3400 = vmatprep.subr.bf16.mxu0 %v3755_v0 }
 0x462   : > { %3262 = vmatmul.mubr.msk.f32.vlgmr.msra.gmra.mrb[8].mxu1 %vm2280_vm5, %v2333_v18 }
 0x463   : > { %3384 = vmatpush3.bf16.msra.mxu1 %v3383_v44  ;;  %3272 = vmatprep.mubr.msk.f32.mxu1 %vm3756_vm0, %v3757_v1 }
 0x464   : > { %3385 = vmatprep.subr.bf16.mxu1 %v3755_v0 }
 0x467   : > { %3387 = vmatpush3.bf16.msra.mxu1 %v3386_v48  ;;  %v2787_v48 = vld [vmem:[#allocation10 + $0x30] sm:$0xff] }
 0x468   : > { %3394 = vmatprep.subr.bf16.mxu1 %v3755_v0 }
 0x477   : > { %v2316_v32 = vpop.xlane.xlu1 %2315 }
 0x478   : > { %3518 = vrcp.f32 %v2316_v32  ;;  %v2310_v6 = vpop.xlane.xlu0 %2309 }
 0x479   : > { %3520 = vrcp.f32 %v2310_v6 }
 0x47c   : > { %v2313_v46 = vpop.xlane.xlu0 %2312 }
 0x47d   : > { %3522 = vrcp.f32 %v2313_v46 }
 0x482   : > { %v3519_v58 = vpop.eup %3518 }
 0x483   : > { %v3521_v20 = vpop.eup %3520  ;;  %v2324_v49 = vmul.f32 %v3519_v58, %v2316_v32  ;;  %v2788_v32 = vld [vmem:[#allocation10 + $0x38] sm:$0xff] }
 0x484   : > { %v2322_v7 = vmul.f32 %v3521_v20, %v2310_v6 }
 0x485   : > { %v2328_v60 = vsub.f32 2.0, %v2324_v49 }
 0x486   : > { %v2326_v50 = vsub.f32 2.0, %v2322_v7  ;;  %v3410_v7 = vpack.c.bf16 %v2788_v32, %v2787_v48 }
 0x487   : > { %v3523_v53 = vpop.eup %3522  ;;  %v2332_v57 = vmul.f32 %v3519_v58, %v2328_v60 }
 0x488   : > { %v2330_v62 = vmul.f32 %v3521_v20, %v2326_v50  ;;  %v2323_v59 = vmul.f32 %v3523_v53, %v2313_v46 }
 0x489   : > { %v2336_v5 = vmul.f32 %v4408_v47, %v2332_v57 }
 0x48a   : > { %v2334_v63 = vmul.f32 %v4406_v15, %v2330_v62  ;;  %v2327_v2 = vsub.f32 2.0, %v2323_v59  ;;  %v3398_v15 = vpack.c.bf16 %v1931_v4, %v1795_v56 }
 0x48c   : > { %v2331_v55 = vmul.f32 %v3523_v53, %v2327_v2  ;;  %3273 = vmatmul.mubr.msk.f32.vlgmr.msra.gmra.mrb[10].mxu1 %vm2280_vm5, %v2334_v63 }
 0x48d   : > { %3396 = vmatpush3.bf16.msra.mxu1 %v3395_v3  ;;  %3294 = vmatprep.mubr.msk.f32.mxu1 %vm3756_vm0, %v3757_v1 }
 0x48e   : > { %v2335_v23 = vmul.f32 %v4418_v51, %v2331_v55  ;;  %3397 = vmatprep.subr.bf16.mxu1 %v3755_v0  ;;  %v3404_v51 = vpack.c.bf16 %v2784_v35, %v2783_v34 }
 0x490   : > { %3284 = vmatmul.mubr.msk.f32.vlgmr.msra.gmra.mrb[6].mxu0 %vm2280_vm5, %v2335_v23 }
 0x491   : > { %3399 = vmatpush3.bf16.msra.mxu1 %v3398_v15  ;;  %3313 = vmatprep.mubr.msk.f32.mxu0 %vm3756_vm0, %v3757_v1  ;;  %v3091_v15 = vld [vmem:[%s4627_s7] ss:$0 sm:$0xff] }
 0x492   : > { %3402 = vmatpush3.bf16.msra.mxu0 %v3401_v41 }
 0x493   : > { %3403 = vmatprep.subr.bf16.mxu0 %v3755_v0 }
 0x494   : > { %3295 = vmatmul.mubr.msk.f32.vlgmr.msra.gmra.mrb[12].mxu1 %vm2280_vm5, %v2336_v5 }
 0x496   : > { %3405 = vmatpush3.bf16.msra.mxu0 %v3404_v51 }
 0x497   : > { %3406 = vmatprep.subr.bf16.mxu0 %v3755_v0 }
 0x49a   : > { %3408 = vmatpush3.bf16.msra.mxu0 %v3407_v13 }
 0x49b   : > { %3409 = vmatprep.subr.bf16.mxu0 %v3755_v0 }
 0x49e   : > { %3411 = vmatpush3.bf16.msra.mxu0 %v3410_v7 }
 0x535   : > { %v2406_v40 = vpop.f32.mrb[8].mxu1 }
 0x536   : > { %v3263_v36 = vpop.f32.mrb[9].mxu1 }
 0x55f   : > { %v2479_v24 = vpop.f32.mrb[10].mxu1 }
 0x560   : > { %v3274_v1 = vpop.f32.mrb[11].mxu1 }
 0x563   : > { %v2552_v25 = vpop.f32.mrb[6].mxu0 }
 0x564   : > { %v2629_v47 = vcombine.low %v2406_v40, %v2552_v25  ;;  %v2630_v33 = vcombine.high %v2406_v40, %v2552_v25  ;;  %v3285_v26 = vpop.f32.mrb[7].mxu0 }
 0x566   : > { %v2637_v30 = vrot.slane %v2629_v47, %v4143_v54  ;;  %v2644_v9 = vrot.slane %v2630_v33, %v4143_v54 }
 0x567   : > { %v2625_v27 = vpop.f32.mrb[12].mxu1 }
 0x568   : > { %v2645_v28 = vcombine.low %v2479_v24, %v2625_v27  ;;  %v2646_v29 = vcombine.high %v2479_v24, %v2625_v27  ;;  %v3296_v22 = vpop.f32.mrb[13].mxu1 }
 0x56a   : > { %v2653_v10 = vrot.slane %v2645_v28, %v4143_v54  ;;  %v2660_v19 = vrot.slane %v2646_v29, %v4143_v54 }
 0x56c   : > { %v2661_v31 = vcombine.low %v2637_v30, %v2653_v10  ;;  %v2662_v37 = vcombine.high %v2637_v30, %v2653_v10  ;;  %v2677_v39 = vcombine.low %v2644_v9, %v2660_v19  ;;  %v2678_v38 = vcombine.high %v2644_v9, %v2660_v19 }
 0x56e   : > { %v2669_v12 = vrot.slane %v2661_v31, %v4147_v61  ;;  %v2676_v14 = vrot.slane %v2662_v37, %v4147_v61  ;;  %v2685_v16 = vrot.slane %v2677_v39, %v4147_v61  ;;  %v2692_v17 = vrot.slane %v2678_v38, %v4147_v61 }
 0x570   : > { %v2697_v18 = vcombine.low %v2669_v12, %v2676_v14  ;;  %v3089_v44 = vcombine.high %v2669_v12, %v2676_v14  ;;  %v2713_v45 = vcombine.low %v2685_v16, %v2692_v17  ;;  %v3090_v43 = vcombine.high %v2685_v16, %v2692_v17 }
 0x572   : > { %v2704_v6 = vrot.slane %v2697_v18, %v4143_v54  ;;  %v2712_v46 = vrot.slane %v3089_v44, %v4143_v54  ;;  %v2720_v58 = vrot.slane %v2713_v45, %v4143_v54  ;;  %v2728_v20 = vrot.slane %v3090_v43, %v4143_v54 }
 0x574   : > { %v2729_v49 = vcombine.low %v2704_v6, %v2712_v46  ;;  %v2745_v50 = vcombine.low %v2720_v58, %v2728_v20  ;;  %v2730_v53 = vcombine.high %v2704_v6, %v2712_v46  ;;  %v2746_v52 = vcombine.high %v2720_v58, %v2728_v20 }
 0x576   : > { %v2737_v62 = vrot.slane %v2729_v49, %v4147_v61  ;;  %v2753_v59 = vrot.slane %v2745_v50, %v4147_v61  ;;  %v2744_v60 = vrot.slane %v2730_v53, %v4147_v61  ;;  %v2760_v63 = vrot.slane %v2746_v52, %v4147_v61 }
 0x578   : > { %v2762_v2 = vcombine.high %v2737_v62, %v2753_v59  ;;  %v2763_v3 = vcombine.low %v2744_v60, %v2760_v63  ;;  %v2764_v54 = vcombine.high %v2744_v60, %v2760_v63  ;;  %v2761_v0 = vcombine.low %v2737_v62, %v2753_v59 }
 0x57a   : > { %2766 = vrot.lane.b32.xlu0 %v2762_v2, %s3766_s18 }
 0x57e   : > { %2770 = vrot.lane.b32.xlu0 %v2763_v3, %s3765_s17 }
 0x582   : > { %2774 = vrot.lane.b32.xlu0 %v2764_v54, %s3762_s25 }
 0x5ec   : > { %v2767_v4 = vpop.permute.xlu0 %2766 }
 0x5ed   : > { %v2777_v56 = vsel %vm1932_vm2, %v2761_v0, %v2767_v4 }
 0x5f0   : > { %v2771_v55 = vpop.permute.xlu0 %2770 }
 0x5f1   : > { %v2778_v57 = vsel %vm2280_vm5, %v2777_v56, %v2771_v55 }
 0x5f4   : > { %v2775_v61 = vpop.permute.xlu0 %2774 }
 0x5f5   : > { %v2780_v23 = vsel %vm2779_vm6, %v2778_v57, %v2775_v61 }
 0x5f6   : > { %3314 = vmatmul.mubr.msk.f32.vlgmr.msra.gmra.mrb[8].mxu0 %vm424_vm1, %v2780_v23 }
 0x6c9   : > { %v2865_v5 = vpop.f32.mrb[8].mxu0 }
 0x6ca   : > { %v2866_v8 = vadd.f32 %v3091_v15, %v2865_v5  ;;  %v3315_v21 = vpop.f32.mrb[9].mxu0 }
 0x6cc   : > { %2870 = vst.msk [vmem:[%s403_s10] sm:$0xf] %vm2869_vm7, %v2866_v8 }
 0x6cd   : > { %3681 = shalt.err (!%p3678_p3)
}
 0x6ce   : > { %s3682_s24 = scalar_lea.hbm %s4576_s19, 64  ;;  %s3686_s18 = scalar_lea.hbm %s4628_s8, 128 }
 0x6cf   : > { %p3683_p9 = scmp.ne.s32.totalorder %s4576_s19, %s3682_s24  ;;  %p3687_p7 = scmp.lt.u32.totalorder %s4576_s19, %s4628_s8 }
 0x6d0   : > { %p3688_p12 = scmp.lt.u32.totalorder %s3686_s18, %s3682_s24  ;;  %p3690_p2 = scmp.lt.u32.totalorder %s3682_s24, %s4576_s19 }
 0x6d1   : > { %p3684_p13 = pnand %p3683_p9, %p3967_p5 }
 0x6d2   : > { %p3689_p1 = por %p3688_p12, %p3687_p7 }
 0x6d3   : > { %p3685_p11 = pneg %p3684_p13 }
 0x6d4   : > { %p3691_p4 = por %p3690_p2, %p3689_p1 }
 0x6d6   : > { %p3692_p0 = pnand %p3691_p4, %p3685_p11 }
 0x6d8   : > { %3695 = shalt.err (!%p3692_p0)
}
 0x6d9   : > { %3428 = dma.vmem_to_hbm [thread:$0]  (%p3967_p5), %s4578_s11, 64, %s4576_s19, %s2872_s15  }
 0x6da PF: > { %s4660_s13 = sld [smem:[#allocation17_spill]]  ;;  %s4661_s27 = sld [smem:[#allocation18_spill]] }
 0x6db   : > { %p4663_p6 = scmp.ge.s32.totalorder %s3746_s30, 2 }
 0x6e0   : > { %s2897_s10 = sand.u32 1, %s4660_s13   ;;  %p4662_p8 = scmp.ne.s32.totalorder %s4661_s27, 0 }
 0x6e1   : > { %s2898_s14 = scalar_lea.sflag [#allocation4], %s2897_s10 }
 0x6e2   : > { %p3448_p10 = pnand %p4663_p6, %p4662_p8 }
 0x6e4   : > { %3729 = dma.done.wait (!%p3448_p10), %s2898_s14, 64  }
 0x6e5   : > { %3731 = vsyncadd (!%p3448_p10), %s2898_s14, 4294967232  ;;  %p25_p3 = scmp.ge.s32.totalorder %s3953_s26, 4   ;;  %s4664_s27 = smov %s3738_s28 }
 0x6e6   : > { %s4665_s28 = smov %s3742_s29  ;;  %s4666_s29 = smov %s3963_s22 }
 0x6e7   : > { %s4667_s30 = smov %s3953_s26  ;;  %27 = sbr.rel (!%p25_p3) target bundleno = 11 (0xb), region = 122 }
 0x6ee   :  { %2903 = vsyncpa [#allocation3], 1 }
 0x6ef   :  { %2905 = vsyncpa [#allocation3 + $0x1], 1 }
 0x6f0   :  { %2906 = vsyncpa [#allocation6], 1 }
 0x6f1   :  { %2908 = vsyncpa [#allocation6 + $0x1], 1 }
 0x6f2   :  { %2909 = vsyncpa [#allocation9], 1 }
 0x6f3   :  { %2910 = vsyncpa [#allocation4], 1 }
 0x6f4   :  { %2912 = vsyncpa [#allocation4 + $0x1], 1 }

</bundles_post_ra>
